<compile_context>
chip_gen: v5e
topology: v5e:2x2
jax: 0.10.0
libtpu: 0.0.40
codegen_flags: <defaults>
</compile_context>

<pallas_src>
import functools

import jax
import jax.numpy as jnp
from jax.experimental import pallas as pl
from jax.experimental.pallas import tpu as pltpu

CP = 128                       # padded lane width for channels / fc features
MXU_DTYPE = jnp.bfloat16       # matmul operand dtype
CONV1_BATCH_TILE_CAP = 64      # ~9 MiB of double-buffered VMEM per block
CONV2_BATCH_TILE_CAP = 32      # ~15 MiB incl. weights -> safe on v7x (32 MiB scoped)


def _round_up(x, m=128):
    return ((x + m - 1) // m) * m


def _pick_batch_tile(n, cap):
    """Largest divisor of n that is <= cap and keeps >= 2 grid blocks (v7x)."""
    if n <= 1:
        return 1
    target = min(cap, max(1, n // 2))
    for bt in range(target, 0, -1):
        if n % bt == 0:
            return bt
    return 1


# ---------------------------------------------------------------------------
# Pallas kernels
# ---------------------------------------------------------------------------
def _gemm_bias_relu_pool(a, w, b, seg):
    """relu(a @ w + b) then max over the four 2x2-pool tap segments (f32)."""
    y = jnp.dot(a, w, preferred_element_type=jnp.float32)
    y = jnp.maximum(y + b, 0.0)                 # one bias broadcast, f32 epilogue
    return jnp.maximum(jnp.maximum(y[0 * seg:1 * seg], y[1 * seg:2 * seg]),
                       jnp.maximum(y[2 * seg:3 * seg], y[3 * seg:4 * seg]))


def _conv_pool_kernel(a_ref, w_ref, b_ref, o_ref):
    """Fused conv-as-GEMM + bias + ReLU + 2x2 max-pool for B_TILE images.

    a_ref: (1, 4*B_TILE*PQp, Kp)  rows ordered (tap, image, pooled pixel)
    w_ref: (Kp, CP)               zero-padded GEMM weight (MXU dtype)
    b_ref: (1, CP)                zero-padded bias (f32)
    o_ref: (1, B_TILE*PQp, CP)    pooled output (bf16); rows ordered (image, pq)
    """
    seg = o_ref.shape[1]                        # B_TILE * PQp, multiple of 8
    pooled = _gemm_bias_relu_pool(a_ref[0], w_ref[...], b_ref[...], seg)
    o_ref[0] = pooled.astype(o_ref.dtype)


def _conv2_fc_kernel(a_ref, w2_ref, b2_ref, w1_ref, b1_ref, wf2_ref, bf2_ref,
                     wf3_ref, bf3_ref, o_ref, pool_ref, *, n_pq):
    """conv2(+bias+ReLU+pool) -> fc1 -> ReLU -> fc2 -> ReLU -> fc3, fused.

    a_ref:  (1, 4*B_TILE*PQp, K2p)  rows ordered (tap, pooled pixel, image)
    w1_ref: (n_pq, CP, F1P)         fc1 weight per real pooled pixel
    o_ref:  (1, B_TILE, NOUTP)      final logits (padded lanes are zero)
    pool_ref scratch: (B_TILE*PQp, CP) f32, rows ordered (pooled pixel, image)
    """
    seg = pool_ref.shape[0]                      # PQp * B_TILE, multiple of 8
    pool_ref[...] = _gemm_bias_relu_pool(a_ref[0], w2_ref[...], b2_ref[...], seg)

    bt = o_ref.shape[1]
    # fc1: contract over (real pooled pixel, channel).  Padded pixel rows
    # (n_pq..PQp-1) and padded channel lanes never contribute (skipped / zero
    # weight rows), so the padded conv2 output is consumed exactly.
    h = jnp.dot(pool_ref[pl.ds(0, bt)].astype(w1_ref.dtype), w1_ref[0],
                preferred_element_type=jnp.float32)
    for p_idx in range(1, n_pq):
        xs = pool_ref[pl.ds(p_idx * bt, bt)].astype(w1_ref.dtype)
        h = h + jnp.dot(xs, w1_ref[p_idx], preferred_element_type=jnp.float32)
    h = jnp.maximum(h + b1_ref[...], 0.0)

    h = jnp.dot(h.astype(wf2_ref.dtype), wf2_ref[...],
                preferred_element_type=jnp.float32)
    h = jnp.maximum(h + bf2_ref[...], 0.0)
    # TODO(synk): nn.Dropout(p=0.5) implemented as identity (eval-mode
    # semantics); PyTorch train-mode RNG dropout is not replicated.
    h = jnp.dot(h.astype(wf3_ref.dtype), wf3_ref[...],
                preferred_element_type=jnp.float32)
    o_ref[0] = (h + bf3_ref[...]).astype(o_ref.dtype)


# ---------------------------------------------------------------------------
# Wrapper-side patch construction (XLA glue: pad / slice / transpose only)
# ---------------------------------------------------------------------------
def _pool_patches(x_nhwc, kernel_size, padding, k_pad, b_tile, dtype, *,
                  pq_major):
    """Blocked im2col patch matrices for fused conv + ReLU + 2x2 max-pool.

    Returns a of shape (nb, 4*b_tile*PQp, k_pad) where rows within a block are
    ordered (tap, image, pq) when pq_major=False, or (tap, pq, image) when
    pq_major=True, plus (Po, Qo, PQp).
    """
    N, H, W, C = x_nhwc.shape
    KH = KW = kernel_size
    Ho = H + 2 * padding - KH + 1
    Wo = W + 2 * padding - KW + 1
    Po, Qo = Ho // 2, Wo // 2                    # floor mode, like F.max_pool2d
    PQ = Po * Qo
    PQp = _round_up(PQ, 8)
    K = KH * KW * C
    nb = N // b_tile

    xp = jnp.pad(x_nhwc, ((0, 0), (padding,) * 2, (padding,) * 2, (0, 0)))
    # im2col, feature index = (kh*KW + kw)*C + cin to match the weight rows
    cols = [xp[:, di:di + Ho, dj:dj + Wo, :]
            for di in range(KH) for dj in range(KW)]
    patches = jnp.concatenate(cols, axis=-1)                 # (N, Ho, Wo, K)
    patches = patches[:, :2 * Po, :2 * Qo, :].reshape(N, Po, 2, Qo, 2, K)
    patches = jnp.transpose(patches, (0, 2, 4, 1, 3, 5)).reshape(N, 4, PQ, K)
    patches = jnp.pad(patches, ((0, 0), (0, 0), (0, PQp - PQ), (0, k_pad - K)))
    a = patches.reshape(nb, b_tile, 4, PQp, k_pad)
    if pq_major:
        a = jnp.transpose(a, (0, 2, 3, 1, 4))    # (nb, 4, PQp, bt, Kp)
    else:
        a = jnp.transpose(a, (0, 2, 1, 3, 4))    # (nb, 4, bt, PQp, Kp)
    a = a.reshape(nb, 4 * b_tile * PQp, k_pad)
    return a.astype(dtype), Po, Qo, PQp


# ---------------------------------------------------------------------------
# pallas_call wrappers
# ---------------------------------------------------------------------------
def conv_relu_pool(x_nhwc, w_pad, b_pad, *, kernel_size, padding, b_tile):
    """max_pool2d(relu(conv2d(x))) as one batched pallas_call -> (N,Po,Qo,CP)."""
    N = x_nhwc.shape[0]
    Kp = w_pad.shape[0]
    a, Po, Qo, PQp = _pool_patches(x_nhwc, kernel_size, padding, Kp, b_tile,
                                   w_pad.dtype, pq_major=False)
    nb = N // b_tile
    m_in, m_out = 4 * b_tile * PQp, b_tile * PQp

    out = pl.pallas_call(
        _conv_pool_kernel,
        out_shape=jax.ShapeDtypeStruct((nb, m_out, CP), w_pad.dtype),
        grid=(nb,),
        in_specs=[
            pl.BlockSpec((1, m_in, Kp), lambda i: (i, 0, 0)),
            pl.BlockSpec((Kp, CP), lambda i: (0, 0)),
            pl.BlockSpec((1, CP), lambda i: (0, 0)),
        ],
        out_specs=pl.BlockSpec((1, m_out, CP), lambda i: (i, 0, 0)),
        compiler_params=pltpu.CompilerParams(
            dimension_semantics=("parallel",)),     # v7x: blocks across both TCs
    )(a, w_pad, b_pad)
    # (nb, bt*PQp, CP) -> (N, Po, Qo, CP), dropping the PQ padding rows.
    return out.reshape(N, PQp, CP)[:, :Po * Qo, :].reshape(N, Po, Qo, CP)


def conv2_fc_stack(x_nhwc, p, *, kernel_size, padding, b_tile):
    """conv2+ReLU+pool fused with fc1->ReLU->fc2->ReLU->(drop=id)->fc3."""
    N = x_nhwc.shape[0]
    Kp = p["conv2_w"].shape[0]
    a, Po, Qo, PQp = _pool_patches(x_nhwc, kernel_size, padding, Kp, b_tile,
                                   p["conv2_w"].dtype, pq_major=True)
    nb = N // b_tile
    m_in = 4 * b_tile * PQp
    nout_p = p["fc3_w"].shape[1]

    out = pl.pallas_call(
        functools.partial(_conv2_fc_kernel, n_pq=Po * Qo),
        out_shape=jax.ShapeDtypeStruct((nb, b_tile, nout_p), jnp.float32),
        grid=(nb,),
        in_specs=[
            pl.BlockSpec((1, m_in, Kp), lambda i: (i, 0, 0)),
            pl.BlockSpec(p["conv2_w"].shape, lambda i: (0, 0)),
            pl.BlockSpec(p["conv2_b"].shape, lambda i: (0, 0)),
            pl.BlockSpec(p["fc1_w"].shape, lambda i: (0, 0, 0)),
            pl.BlockSpec(p["fc1_b"].shape, lambda i: (0, 0)),
            pl.BlockSpec(p["fc2_w"].shape, lambda i: (0, 0)),
            pl.BlockSpec(p["fc2_b"].shape, lambda i: (0, 0)),
            pl.BlockSpec(p["fc3_w"].shape, lambda i: (0, 0)),
            pl.BlockSpec(p["fc3_b"].shape, lambda i: (0, 0)),
        ],
        out_specs=pl.BlockSpec((1, b_tile, nout_p), lambda i: (i, 0, 0)),
        scratch_shapes=[pltpu.VMEM((b_tile * PQp, CP), jnp.float32)],
        compiler_params=pltpu.CompilerParams(
            dimension_semantics=("parallel",)),
    )(a, p["conv2_w"], p["conv2_b"], p["fc1_w"], p["fc1_b"],
      p["fc2_w"], p["fc2_b"], p["fc3_w"], p["fc3_b"])
    return out.reshape(N, nout_p)


# ---------------------------------------------------------------------------
# One-time parameter preprocessing (outside the jitted forward)
# ---------------------------------------------------------------------------
def preprocess_params(params, imsize, kernel_size=5, mxu_dtype=MXU_DTYPE):
    """Lane-dense GEMM weights: conv rows ordered (kh, kw, cin[, padded]); the
    conv2 rows use cin padded to 128 so conv1's padded output feeds it directly;
    fc1 rows are re-ordered so the PyTorch NCHW flatten is baked into the weight."""
    z = 0.5 * (imsize - 2)
    z = int(0.5 * (z - 2))
    zz = z * z

    def conv_gemm_w(w_oihw, cin_pad):
        cout, cin, kh, kw = w_oihw.shape
        w = jnp.transpose(w_oihw, (2, 3, 1, 0))           # (kh, kw, cin, cout)
        w = jnp.pad(w, ((0, 0), (0, 0), (0, cin_pad - cin), (0, CP - cout)))
        w = w.reshape(kh * kw * cin_pad, CP)
        k = w.shape[0]
        w = jnp.pad(w, ((0, _round_up(k) - k), (0, 0)))
        return w.astype(mxu_dtype)

    def fc1_gemm_w(w_oi):                                  # PyTorch (120, 16*z*z)
        fout, fin = w_oi.shape
        cin = fin // zz
        w = w_oi.reshape(fout, cin, zz)                    # [f, c, pq]
        w = jnp.transpose(w, (2, 1, 0))                    # [pq, c, f]
        w = jnp.pad(w, ((0, 0), (0, CP - cin), (0, _round_up(fout) - fout)))
        return w.astype(mxu_dtype)                         # (zz, 128, 128)

    def fc_gemm_w(w_oi):                                   # PyTorch (out, in)
        o, i = w_oi.shape
        w = jnp.pad(w_oi.T, ((0, _round_up(i) - i), (0, _round_up(o) - o)))
        return w.astype(mxu_dtype)

    def pad_bias(b, width=CP):
        return jnp.pad(b, (0, width - b.shape[0])).reshape(1, width).astype(jnp.float32)

    return {
        "conv1_w": conv_gemm_w(params["conv1_w"], params["conv1_w"].shape[1]),
        "conv1_b": pad_bias(params["conv1_b"]),
        "conv2_w": conv_gemm_w(params["conv2_w"], CP),
        "conv2_b": pad_bias(params["conv2_b"]),
        "fc1_w": fc1_gemm_w(params["fc1_w"]),
        "fc1_b": pad_bias(params["fc1_b"], _round_up(params["fc1_w"].shape[0])),
        "fc2_w": fc_gemm_w(params["fc2_w"]),
        "fc2_b": pad_bias(params["fc2_b"], _round_up(params["fc2_w"].shape[0])),
        "fc3_w": fc_gemm_w(params["fc3_w"]),
        "fc3_b": pad_bias(params["fc3_b"], _round_up(params["fc3_w"].shape[0])),
    }


# ---------------------------------------------------------------------------
# LeNet forward
# ---------------------------------------------------------------------------
def lenet_forward(prepped, x_nchw, *, out_chan, kernel_size):
    p = prepped
    N = x_nchw.shape[0]
    # NHWC, MXU-dtype operands; all epilogue math stays f32 inside the kernels.
    x = jnp.transpose(x_nchw, (0, 2, 3, 1)).astype(p["conv1_w"].dtype)

    x = conv_relu_pool(x, p["conv1_w"], p["conv1_b"],
                       kernel_size=kernel_size, padding=1,
                       b_tile=_pick_batch_tile(N, CONV1_BATCH_TILE_CAP))
    # conv1's padded 128-channel output feeds conv2 directly (no slice/re-pad);
    # conv2 + pool + the whole FC stack run in one fused kernel.
    out = conv2_fc_stack(x, p, kernel_size=kernel_size, padding=1,
                         b_tile=_pick_batch_tile(N, CONV2_BATCH_TILE_CAP))
    return out[:, :out_chan]


# ---------------------------------------------------------------------------
# Reference (pure JAX / XLA) and parameter init
# ---------------------------------------------------------------------------
def reference_forward(params, x_nchw):
    def conv(x, w, b):
        y = jax.lax.conv_general_dilated(
            x, w, window_strides=(1, 1), padding=[(1, 1), (1, 1)],
            dimension_numbers=("NCHW", "OIHW", "NCHW"))
        return y + b[None, :, None, None]

    def pool(x):
        return jax.lax.reduce_window(x, -jnp.inf, jax.lax.max,
                                     (1, 1, 2, 2), (1, 1, 2, 2), "VALID")

    x = pool(jax.nn.relu(conv(x_nchw, params["conv1_w"], params["conv1_b"])))
    x = pool(jax.nn.relu(conv(x, params["conv2_w"], params["conv2_b"])))
    x = x.reshape(x.shape[0], -1)
    x = jax.nn.relu(x @ params["fc1_w"].T + params["fc1_b"])
    x = jax.nn.relu(x @ params["fc2_w"].T + params["fc2_b"])
    return x @ params["fc3_w"].T + params["fc3_b"]


def init_params(key, in_chan, out_chan, imsize, kernel_size=5):
    z = 0.5 * (imsize - 2)
    z = int(0.5 * (z - 2))
    ks = jax.random.split(key, 10)

    def w(k, shape, scale=0.05):
        return scale * jax.random.normal(k, shape, jnp.float32)

    return {
        "conv1_w": w(ks[0], (6, in_chan, kernel_size, kernel_size)),
        "conv1_b": w(ks[1], (6,)),
        "conv2_w": w(ks[2], (16, 6, kernel_size, kernel_size)),
        "conv2_b": w(ks[3], (16,)),
        "fc1_w": w(ks[4], (120, 16 * z * z)),
        "fc1_b": w(ks[5], (120,)),
        "fc2_w": w(ks[6], (84, 120)),
        "fc2_b": w(ks[7], (84,)),
        "fc3_w": w(ks[8], (out_chan, 84)),
        "fc3_b": w(ks[9], (out_chan,)),
    }


if __name__ == "__main__":
    batch, in_chan, out_chan, imsize, kernel_size = 2, 4, 10, 16, 5

    key = jax.random.PRNGKey(0)
    k_params, k_x = jax.random.split(key)
    params = init_params(k_params, in_chan, out_chan, imsize, kernel_size)
    prepped = preprocess_params(params, imsize, kernel_size)
    x = jax.random.normal(k_x, (batch, in_chan, imsize, imsize), jnp.float32)

    fwd = jax.jit(functools.partial(lenet_forward,
                                    out_chan=out_chan, kernel_size=kernel_size))
    out = jax.block_until_ready(fwd(prepped, x))

    assert out.shape == (batch, out_chan), out.shape
    assert out.dtype == jnp.float32
    assert bool(jnp.all(jnp.isfinite(out)))

    ref = reference_forward(params, x)
    assert bool(jnp.allclose(out, ref, atol=2e-2, rtol=2e-2))

    print("KERNEL_OK")
</pallas_src>

<mosaic_0001>
module attributes {stable_mosaic.version = 11 : i64} {
  func.func @_conv_pool_kernel(%arg0: i32, %arg1: memref<1x224x128xbf16, #tpu.memory_space<vmem>>, %arg2: memref<128x128xbf16, #tpu.memory_space<vmem>>, %arg3: memref<1x128xf32, #tpu.memory_space<vmem>>, %arg4: memref<1x56x128xbf16, #tpu.memory_space<vmem>>) attributes {dimension_semantics = [#tpu.dimension_semantics<parallel>], iteration_bounds = array<i64: 2>, scalar_prefetch = 0 : i64, scratch_operands = 0 : i64, tpu.core_type = #tpu.core_type<tc>, window_params = [{transform_indices = @transform_0, window_bounds = array<i64: 1, 224, 128>}, {pipeline_mode = #tpu.pipeline_mode<synchronous>, transform_indices = @transform_1, window_bounds = array<i64: 128, 128>}, {pipeline_mode = #tpu.pipeline_mode<synchronous>, transform_indices = @transform_2, window_bounds = array<i64: 1, 128>}, {transform_indices = @transform_3, window_bounds = array<i64: 1, 56, 128>}]} {
    %c0 = arith.constant 0 : index
    %c0_0 = arith.constant 0 : index
    %c0_1 = arith.constant 0 : index
    %0 = vector.load %arg1[%c0, %c0_0, %c0_1] : memref<1x224x128xbf16, #tpu.memory_space<vmem>>, vector<1x224x128xbf16>
    %1 = vector.shape_cast %0 : vector<1x224x128xbf16> to vector<224x128xbf16>
    %c0_2 = arith.constant 0 : index
    %c0_3 = arith.constant 0 : index
    %2 = vector.load %arg2[%c0_2, %c0_3] : memref<128x128xbf16, #tpu.memory_space<vmem>>, vector<128x128xbf16>
    %c0_4 = arith.constant 0 : index
    %c0_5 = arith.constant 0 : index
    %3 = vector.load %arg3[%c0_4, %c0_5] : memref<1x128xf32, #tpu.memory_space<vmem>>, vector<1x128xf32>
    %cst = arith.constant dense<0.000000e+00> : vector<224x128xf32>
    %4 = tpu.matmul %1, %2, %cst {dimension_numbers = #tpu.dot_dimension_numbers<[1], [0], [0], [1], [0, 0, 1, 1], [], []>} : vector<224x128xbf16>, vector<128x128xbf16>, vector<224x128xf32> -> vector<224x128xf32>
    %5 = vector.broadcast %3 : vector<1x128xf32> to vector<224x128xf32>
    %6 = arith.addf %4, %5 : vector<224x128xf32>
    %cst_6 = arith.constant 0.000000e+00 : f32
    %7 = vector.broadcast %cst_6 : f32 to vector<224x128xf32>
    %8 = arith.maximumf %6, %7 : vector<224x128xf32>
    %9 = vector.extract_strided_slice %8 {offsets = [0, 0], sizes = [56, 128], strides = [1, 1]} : vector<224x128xf32> to vector<56x128xf32>
    %10 = vector.extract_strided_slice %8 {offsets = [56, 0], sizes = [56, 128], strides = [1, 1]} : vector<224x128xf32> to vector<56x128xf32>
    %11 = arith.maximumf %9, %10 : vector<56x128xf32>
    %12 = vector.extract_strided_slice %8 {offsets = [112, 0], sizes = [56, 128], strides = [1, 1]} : vector<224x128xf32> to vector<56x128xf32>
    %13 = vector.extract_strided_slice %8 {offsets = [168, 0], sizes = [56, 128], strides = [1, 1]} : vector<224x128xf32> to vector<56x128xf32>
    %14 = arith.maximumf %12, %13 : vector<56x128xf32>
    %15 = arith.maximumf %11, %14 : vector<56x128xf32>
    %16 = arith.truncf %15 : vector<56x128xf32> to vector<56x128xbf16>
    %c0_7 = arith.constant 0 : index
    %c0_8 = arith.constant 0 : index
    %c0_9 = arith.constant 0 : index
    %17 = vector.load %arg4[%c0_7, %c0_8, %c0_9] : memref<1x56x128xbf16, #tpu.memory_space<vmem>>, vector<1x56x128xbf16>
    %18 = vector.shape_cast %17 : vector<1x56x128xbf16> to vector<56x128xbf16>
    %19 = vector.shape_cast %16 : vector<56x128xbf16> to vector<1x56x128xbf16>
    tpu.vector_store %arg4[%c0_7, %c0_8, %c0_9], %19 {strides = array<i32>} : memref<1x56x128xbf16, #tpu.memory_space<vmem>>, vector<1x56x128xbf16>,
    return
  }
  func.func @transform_0(%arg0: i32) -> (i32, i32, i32) {
    %c0_i32 = arith.constant 0 : i32
    %c0_i32_0 = arith.constant 0 : i32
    %c0_i32_1 = arith.constant 0 : i32
    return %arg0, %c0_i32, %c0_i32_0 : i32, i32, i32
  }
  func.func @transform_1(%arg0: i32) -> (i32, i32) {
    %c0_i32 = arith.constant 0 : i32
    %c0_i32_0 = arith.constant 0 : i32
    %c0_i32_1 = arith.constant 0 : i32
    return %c0_i32, %c0_i32_0 : i32, i32
  }
  func.func @transform_2(%arg0: i32) -> (i32, i32) {
    %c0_i32 = arith.constant 0 : i32
    %c0_i32_0 = arith.constant 0 : i32
    %c0_i32_1 = arith.constant 0 : i32
    return %c0_i32, %c0_i32_0 : i32, i32
  }
  func.func @transform_3(%arg0: i32) -> (i32, i32, i32) {
    %c0_i32 = arith.constant 0 : i32
    %c0_i32_0 = arith.constant 0 : i32
    %c0_i32_1 = arith.constant 0 : i32
    return %arg0, %c0_i32, %c0_i32_0 : i32, i32, i32
  }
}

module attributes {stable_mosaic.version = 11 : i64} {
  func.func @_conv2_fc_kernel(%arg0: i32, %arg1: memref<1x32x3200xbf16, #tpu.memory_space<vmem>>, %arg2: memref<3200x128xbf16, #tpu.memory_space<vmem>>, %arg3: memref<1x128xf32, #tpu.memory_space<vmem>>, %arg4: memref<4x128x128xbf16, #tpu.memory_space<vmem>>, %arg5: memref<1x128xf32, #tpu.memory_space<vmem>>, %arg6: memref<128x128xbf16, #tpu.memory_space<vmem>>, %arg7: memref<1x128xf32, #tpu.memory_space<vmem>>, %arg8: memref<128x128xbf16, #tpu.memory_space<vmem>>, %arg9: memref<1x128xf32, #tpu.memory_space<vmem>>, %arg10: memref<1x1x128xf32, #tpu.memory_space<vmem>>, %arg11: memref<8x128xf32, #tpu.memory_space<vmem>>) attributes {dimension_semantics = [#tpu.dimension_semantics<parallel>], iteration_bounds = array<i64: 2>, scalar_prefetch = 0 : i64, scratch_operands = 1 : i64, tpu.core_type = #tpu.core_type<tc>, window_params = [{transform_indices = @transform_0, window_bounds = array<i64: 1, 32, 3200>}, {pipeline_mode = #tpu.pipeline_mode<synchronous>, transform_indices = @transform_1, window_bounds = array<i64: 3200, 128>}, {pipeline_mode = #tpu.pipeline_mode<synchronous>, transform_indices = @transform_2, window_bounds = array<i64: 1, 128>}, {pipeline_mode = #tpu.pipeline_mode<synchronous>, transform_indices = @transform_3, window_bounds = array<i64: 4, 128, 128>}, {pipeline_mode = #tpu.pipeline_mode<synchronous>, transform_indices = @transform_4, window_bounds = array<i64: 1, 128>}, {pipeline_mode = #tpu.pipeline_mode<synchronous>, transform_indices = @transform_5, window_bounds = array<i64: 128, 128>}, {pipeline_mode = #tpu.pipeline_mode<synchronous>, transform_indices = @transform_6, window_bounds = array<i64: 1, 128>}, {pipeline_mode = #tpu.pipeline_mode<synchronous>, transform_indices = @transform_7, window_bounds = array<i64: 128, 128>}, {pipeline_mode = #tpu.pipeline_mode<synchronous>, transform_indices = @transform_8, window_bounds = array<i64: 1, 128>}, {transform_indices = @transform_9, window_bounds = array<i64: 1, 1, 128>}]} {
    %c0 = arith.constant 0 : index
    %c0_0 = arith.constant 0 : index
    %c0_1 = arith.constant 0 : index
    %0 = vector.load %arg1[%c0, %c0_0, %c0_1] : memref<1x32x3200xbf16, #tpu.memory_space<vmem>>, vector<1x32x3200xbf16>
    %1 = vector.shape_cast %0 : vector<1x32x3200xbf16> to vector<32x3200xbf16>
    %c0_2 = arith.constant 0 : index
    %c0_3 = arith.constant 0 : index
    %2 = vector.load %arg2[%c0_2, %c0_3] : memref<3200x128xbf16, #tpu.memory_space<vmem>>, vector<3200x128xbf16>
    %c0_4 = arith.constant 0 : index
    %c0_5 = arith.constant 0 : index
    %3 = vector.load %arg3[%c0_4, %c0_5] : memref<1x128xf32, #tpu.memory_space<vmem>>, vector<1x128xf32>
    %cst = arith.constant dense<0.000000e+00> : vector<32x128xf32>
    %4 = tpu.matmul %1, %2, %cst {dimension_numbers = #tpu.dot_dimension_numbers<[1], [0], [0], [1], [0, 0, 1, 1], [], []>} : vector<32x3200xbf16>, vector<3200x128xbf16>, vector<32x128xf32> -> vector<32x128xf32>
    %5 = vector.broadcast %3 : vector<1x128xf32> to vector<32x128xf32>
    %6 = arith.addf %4, %5 : vector<32x128xf32>
    %cst_6 = arith.constant 0.000000e+00 : f32
    %7 = vector.broadcast %cst_6 : f32 to vector<32x128xf32>
    %8 = arith.maximumf %6, %7 : vector<32x128xf32>
    %9 = vector.extract_strided_slice %8 {offsets = [0, 0], sizes = [8, 128], strides = [1, 1]} : vector<32x128xf32> to vector<8x128xf32>
    %10 = vector.extract_strided_slice %8 {offsets = [8, 0], sizes = [8, 128], strides = [1, 1]} : vector<32x128xf32> to vector<8x128xf32>
    %11 = arith.maximumf %9, %10 : vector<8x128xf32>
    %12 = vector.extract_strided_slice %8 {offsets = [16, 0], sizes = [8, 128], strides = [1, 1]} : vector<32x128xf32> to vector<8x128xf32>
    %13 = vector.extract_strided_slice %8 {offsets = [24, 0], sizes = [8, 128], strides = [1, 1]} : vector<32x128xf32> to vector<8x128xf32>
    %14 = arith.maximumf %12, %13 : vector<8x128xf32>
    %15 = arith.maximumf %11, %14 : vector<8x128xf32>
    %c0_7 = arith.constant 0 : index
    %c0_8 = arith.constant 0 : index
    %16 = vector.load %arg11[%c0_7, %c0_8] : memref<8x128xf32, #tpu.memory_space<vmem>>, vector<8x128xf32>
    tpu.vector_store %arg11[%c0_7, %c0_8], %15 {strides = array<i32>} : memref<8x128xf32, #tpu.memory_space<vmem>>, vector<8x128xf32>,
    %c0_9 = arith.constant 0 : index
    %c0_10 = arith.constant 0 : index
    %17 = vector.load %arg11[%c0_9, %c0_10] : memref<8x128xf32, #tpu.memory_space<vmem>>, vector<1x128xf32>
    %18 = arith.truncf %17 : vector<1x128xf32> to vector<1x128xbf16>
    %c0_11 = arith.constant 0 : index
    %c0_12 = arith.constant 0 : index
    %c0_13 = arith.constant 0 : index
    %19 = vector.load %arg4[%c0_11, %c0_12, %c0_13] : memref<4x128x128xbf16, #tpu.memory_space<vmem>>, vector<1x128x128xbf16>
    %20 = vector.shape_cast %19 : vector<1x128x128xbf16> to vector<128x128xbf16>
    %cst_14 = arith.constant dense<0.000000e+00> : vector<1x128xf32>
    %21 = tpu.matmul %18, %20, %cst_14 {dimension_numbers = #tpu.dot_dimension_numbers<[1], [0], [0], [1], [0, 0, 1, 1], [], []>} : vector<1x128xbf16>, vector<128x128xbf16>, vector<1x128xf32> -> vector<1x128xf32>
    %c1 = arith.constant 1 : index
    %c0_15 = arith.constant 0 : index
    %22 = vector.load %arg11[%c1, %c0_15] : memref<8x128xf32, #tpu.memory_space<vmem>>, vector<1x128xf32>
    %23 = arith.truncf %22 : vector<1x128xf32> to vector<1x128xbf16>
    %c1_16 = arith.constant 1 : index
    %c0_17 = arith.constant 0 : index
    %c0_18 = arith.constant 0 : index
    %24 = vector.load %arg4[%c1_16, %c0_17, %c0_18] : memref<4x128x128xbf16, #tpu.memory_space<vmem>>, vector<1x128x128xbf16>
    %25 = vector.shape_cast %24 : vector<1x128x128xbf16> to vector<128x128xbf16>
    %cst_19 = arith.constant dense<0.000000e+00> : vector<1x128xf32>
    %26 = tpu.matmul %23, %25, %cst_19 {dimension_numbers = #tpu.dot_dimension_numbers<[1], [0], [0], [1], [0, 0, 1, 1], [], []>} : vector<1x128xbf16>, vector<128x128xbf16>, vector<1x128xf32> -> vector<1x128xf32>
    %27 = arith.addf %21, %26 : vector<1x128xf32>
    %c2 = arith.constant 2 : index
    %c0_20 = arith.constant 0 : index
    %28 = vector.load %arg11[%c2, %c0_20] : memref<8x128xf32, #tpu.memory_space<vmem>>, vector<1x128xf32>
    %29 = arith.truncf %28 : vector<1x128xf32> to vector<1x128xbf16>
    %c2_21 = arith.constant 2 : index
    %c0_22 = arith.constant 0 : index
    %c0_23 = arith.constant 0 : index
    %30 = vector.load %arg4[%c2_21, %c0_22, %c0_23] : memref<4x128x128xbf16, #tpu.memory_space<vmem>>, vector<1x128x128xbf16>
    %31 = vector.shape_cast %30 : vector<1x128x128xbf16> to vector<128x128xbf16>
    %cst_24 = arith.constant dense<0.000000e+00> : vector<1x128xf32>
    %32 = tpu.matmul %29, %31, %cst_24 {dimension_numbers = #tpu.dot_dimension_numbers<[1], [0], [0], [1], [0, 0, 1, 1], [], []>} : vector<1x128xbf16>, vector<128x128xbf16>, vector<1x128xf32> -> vector<1x128xf32>
    %33 = arith.addf %27, %32 : vector<1x128xf32>
    %c3 = arith.constant 3 : index
    %c0_25 = arith.constant 0 : index
    %34 = vector.load %arg11[%c3, %c0_25] : memref<8x128xf32, #tpu.memory_space<vmem>>, vector<1x128xf32>
    %35 = arith.truncf %34 : vector<1x128xf32> to vector<1x128xbf16>
    %c3_26 = arith.constant 3 : index
    %c0_27 = arith.constant 0 : index
    %c0_28 = arith.constant 0 : index
    %36 = vector.load %arg4[%c3_26, %c0_27, %c0_28] : memref<4x128x128xbf16, #tpu.memory_space<vmem>>, vector<1x128x128xbf16>
    %37 = vector.shape_cast %36 : vector<1x128x128xbf16> to vector<128x128xbf16>
    %cst_29 = arith.constant dense<0.000000e+00> : vector<1x128xf32>
    %38 = tpu.matmul %35, %37, %cst_29 {dimension_numbers = #tpu.dot_dimension_numbers<[1], [0], [0], [1], [0, 0, 1, 1], [], []>} : vector<1x128xbf16>, vector<128x128xbf16>, vector<1x128xf32> -> vector<1x128xf32>
    %39 = arith.addf %33, %38 : vector<1x128xf32>
    %c0_30 = arith.constant 0 : index
    %c0_31 = arith.constant 0 : index
    %40 = vector.load %arg5[%c0_30, %c0_31] : memref<1x128xf32, #tpu.memory_space<vmem>>, vector<1x128xf32>
    %41 = arith.addf %39, %40 : vector<1x128xf32>
    %cst_32 = arith.constant 0.000000e+00 : f32
    %42 = vector.broadcast %cst_32 : f32 to vector<1x128xf32>
    %43 = arith.maximumf %41, %42 : vector<1x128xf32>
    %44 = arith.truncf %43 : vector<1x128xf32> to vector<1x128xbf16>
    %c0_33 = arith.constant 0 : index
    %c0_34 = arith.constant 0 : index
    %45 = vector.load %arg6[%c0_33, %c0_34] : memref<128x128xbf16, #tpu.memory_space<vmem>>, vector<128x128xbf16>
    %cst_35 = arith.constant dense<0.000000e+00> : vector<1x128xf32>
    %46 = tpu.matmul %44, %45, %cst_35 {dimension_numbers = #tpu.dot_dimension_numbers<[1], [0], [0], [1], [0, 0, 1, 1], [], []>} : vector<1x128xbf16>, vector<128x128xbf16>, vector<1x128xf32> -> vector<1x128xf32>
    %c0_36 = arith.constant 0 : index
    %c0_37 = arith.constant 0 : index
    %47 = vector.load %arg7[%c0_36, %c0_37] : memref<1x128xf32, #tpu.memory_space<vmem>>, vector<1x128xf32>
    %48 = arith.addf %46, %47 : vector<1x128xf32>
    %cst_38 = arith.constant 0.000000e+00 : f32
    %49 = vector.broadcast %cst_38 : f32 to vector<1x128xf32>
    %50 = arith.maximumf %48, %49 : vector<1x128xf32>
    %51 = arith.truncf %50 : vector<1x128xf32> to vector<1x128xbf16>
    %c0_39 = arith.constant 0 : index
    %c0_40 = arith.constant 0 : index
    %52 = vector.load %arg8[%c0_39, %c0_40] : memref<128x128xbf16, #tpu.memory_space<vmem>>, vector<128x128xbf16>
    %cst_41 = arith.constant dense<0.000000e+00> : vector<1x128xf32>
    %53 = tpu.matmul %51, %52, %cst_41 {dimension_numbers = #tpu.dot_dimension_numbers<[1], [0], [0], [1], [0, 0, 1, 1], [], []>} : vector<1x128xbf16>, vector<128x128xbf16>, vector<1x128xf32> -> vector<1x128xf32>
    %c0_42 = arith.constant 0 : index
    %c0_43 = arith.constant 0 : index
    %54 = vector.load %arg9[%c0_42, %c0_43] : memref<1x128xf32, #tpu.memory_space<vmem>>, vector<1x128xf32>
    %55 = arith.addf %53, %54 : vector<1x128xf32>
    %c0_44 = arith.constant 0 : index
    %c0_45 = arith.constant 0 : index
    %c0_46 = arith.constant 0 : index
    %56 = vector.load %arg10[%c0_44, %c0_45, %c0_46] : memref<1x1x128xf32, #tpu.memory_space<vmem>>, vector<1x1x128xf32>
    %57 = vector.shape_cast %56 : vector<1x1x128xf32> to vector<1x128xf32>
    %58 = vector.shape_cast %55 : vector<1x128xf32> to vector<1x1x128xf32>
    tpu.vector_store %arg10[%c0_44, %c0_45, %c0_46], %58 {strides = array<i32>} : memref<1x1x128xf32, #tpu.memory_space<vmem>>, vector<1x1x128xf32>,
    return
  }
  func.func @transform_0(%arg0: i32) -> (i32, i32, i32) {
    %c0_i32 = arith.constant 0 : i32
    %c0_i32_0 = arith.constant 0 : i32
    %c0_i32_1 = arith.constant 0 : i32
    return %arg0, %c0_i32, %c0_i32_0 : i32, i32, i32
  }
  func.func @transform_1(%arg0: i32) -> (i32, i32) {
    %c0_i32 = arith.constant 0 : i32
    %c0_i32_0 = arith.constant 0 : i32
    %c0_i32_1 = arith.constant 0 : i32
    return %c0_i32, %c0_i32_0 : i32, i32
  }
  func.func @transform_2(%arg0: i32) -> (i32, i32) {
    %c0_i32 = arith.constant 0 : i32
    %c0_i32_0 = arith.constant 0 : i32
    %c0_i32_1 = arith.constant 0 : i32
    return %c0_i32, %c0_i32_0 : i32, i32
  }
  func.func @transform_3(%arg0: i32) -> (i32, i32, i32) {
    %c0_i32 = arith.constant 0 : i32
    %c0_i32_0 = arith.constant 0 : i32
    %c0_i32_1 = arith.constant 0 : i32
    %c0_i32_2 = arith.constant 0 : i32
    return %c0_i32, %c0_i32_0, %c0_i32_1 : i32, i32, i32
  }
  func.func @transform_4(%arg0: i32) -> (i32, i32) {
    %c0_i32 = arith.constant 0 : i32
    %c0_i32_0 = arith.constant 0 : i32
    %c0_i32_1 = arith.constant 0 : i32
    return %c0_i32, %c0_i32_0 : i32, i32
  }
  func.func @transform_5(%arg0: i32) -> (i32, i32) {
    %c0_i32 = arith.constant 0 : i32
    %c0_i32_0 = arith.constant 0 : i32
    %c0_i32_1 = arith.constant 0 : i32
    return %c0_i32, %c0_i32_0 : i32, i32
  }
  func.func @transform_6(%arg0: i32) -> (i32, i32) {
    %c0_i32 = arith.constant 0 : i32
    %c0_i32_0 = arith.constant 0 : i32
    %c0_i32_1 = arith.constant 0 : i32
    return %c0_i32, %c0_i32_0 : i32, i32
  }
  func.func @transform_7(%arg0: i32) -> (i32, i32) {
    %c0_i32 = arith.constant 0 : i32
    %c0_i32_0 = arith.constant 0 : i32
    %c0_i32_1 = arith.constant 0 : i32
    return %c0_i32, %c0_i32_0 : i32, i32
  }
  func.func @transform_8(%arg0: i32) -> (i32, i32) {
    %c0_i32 = arith.constant 0 : i32
    %c0_i32_0 = arith.constant 0 : i32
    %c0_i32_1 = arith.constant 0 : i32
    return %c0_i32, %c0_i32_0 : i32, i32
  }
  func.func @transform_9(%arg0: i32) -> (i32, i32, i32) {
    %c0_i32 = arith.constant 0 : i32
    %c0_i32_0 = arith.constant 0 : i32
    %c0_i32_1 = arith.constant 0 : i32
    return %arg0, %c0_i32, %c0_i32_0 : i32, i32, i32
  }
}

</mosaic_0001>

<bundles_post_ra>
// kernel: lenet_forward.2
= control target key start
LH: loop header
LB: loop body
LE: loop exit
PB: predicated region body
PF: predicated region fallthrough
CT: control target
= control target key end

     0   :  { %s747_s12 = smov 0   ;;  %s863_s0 = inlined_call_operand.vmem [shape: bf16[2,224,128], index: 0, kind: input, shape index: {}]   ;;  %s864_s1 = inlined_call_operand.vmem [shape: bf16[128,128], index: 1, kind: input, shape index: {}]   ;;  %s865_s2 = inlined_call_operand.vmem [shape: f32[1,128], index: 2, kind: input, shape index: {}]   ;;  %s866_s3 = inlined_call_operand.vmem [shape: bf16[2,56,128], index: 3, kind: output, shape index: {}]  }
   0x1 LB: > { %s548_s13 = sadd.s32 4294967295, %s725_s12   ;;  %p552_p0 = scmp.ge.s32.totalorder %s725_s12, 1  ;;  %s725_s12 = sphi %s747_s12, %s13_s12  }
   0x2   : > { %p137_p1 = scmp.lt.s32.totalorder %s725_s12, 3 }
   0x4   : > { %p138_p2 = pnand %p552_p0, %p137_p1 }
   0x5   : > { %p161_p3 = scmp.lt.s32.totalorder (!%p138_p2), %s548_s13, 1 }
   0x6   : > { %141 = sbr.rel (%p138_p2) target bundleno = 243 (0xf3), region = 32 }
   0xb   : > { %v666_v0 = vld [vmem:[%s864_s1 + $0x38] sm:$0xff]  ;;  %v665_v1 = vld [vmem:[%s864_s1 + $0x30] sm:$0xff]  ;;  %v664_v2 = vld [vmem:[%s864_s1 + $0x28] sm:$0xff]  ;;  %s868_s13 = smov (!%p161_p3, %s548_s13), 1 }
   0xc   : > { %351 = vmatpush.bf16.msra.mxu0 %v666_v0  ;;  %685 = vmatpush.bf16.msra.mxu2 %v666_v0  ;;  %v663_v3 = vld [vmem:[%s864_s1 + $0x20] sm:$0xff]  ;;  %v662_v4 = vld [vmem:[%s864_s1 + $0x18] sm:$0xff]  ;;  %v661_v5 = vld [vmem:[%s864_s1 + $0x10] sm:$0xff]  ;;  %s708_s28 = smul.u32 112, %s868_s13 }
   0xd   : > { %686 = vmatpush.bf16.msra.mxu3 %v666_v0  ;;  %684 = vmatpush.bf16.msra.mxu1 %v666_v0  ;;  %v660_v6 = vld [vmem:[%s864_s1 + $0x8] sm:$0xff]  ;;  %v659_v7 = vld [vmem:[%s864_s1] sm:$0xff]  ;;  %s709_s9 = smul.u32 28, %s868_s13 }
   0xe   : > { %s789_s6 = scalar_lea.vmem %s863_s0, %s708_s28  ;;  %v816_v32 = vld [vmem:[%s865_s2] ss:$0 sm:$0xff] }
   0xf   : > { %v645_v8 = vld [vmem:[%s789_s6] sm:$0xff]  ;;  %v651_v9 = vld [vmem:[%s789_s6 + $0x30] sm:$0xff]  ;;  %v648_v11 = vld [vmem:[%s789_s6 + $0x18] sm:$0xff]  ;;  %s830_s14 = scalar_lea.vmem %s866_s3, %s709_s9 }
  0x10   : > { %352 = vmatpush.bf16.msra.mxu0 %v665_v1  ;;  %688 = vmatpush.bf16.msra.mxu2 %v665_v1  ;;  %v655_v10 = vld [vmem:[%s789_s6 + $0x50] sm:$0xff]  ;;  %v646_v12 = vld [vmem:[%s789_s6 + $0x8] sm:$0xff]  ;;  %v652_v13 = vld [vmem:[%s789_s6 + $0x38] sm:$0xff] }
  0x11   : > { %689 = vmatpush.bf16.msra.mxu3 %v665_v1  ;;  %687 = vmatpush.bf16.msra.mxu1 %v665_v1  ;;  %v656_v14 = vld [vmem:[%s789_s6 + $0x58] sm:$0xff]  ;;  %v649_v15 = vld [vmem:[%s789_s6 + $0x20] sm:$0xff]  ;;  %v647_v16 = vld [vmem:[%s789_s6 + $0x10] sm:$0xff] }
  0x12   : > { %v653_v17 = vld [vmem:[%s789_s6 + $0x40] sm:$0xff]  ;;  %v650_v19 = vld [vmem:[%s789_s6 + $0x28] sm:$0xff] }
  0x13   : > { %v657_v18 = vld [vmem:[%s789_s6 + $0x60] sm:$0xff]  ;;  %v654_v20 = vld [vmem:[%s789_s6 + $0x48] sm:$0xff] }
  0x14   : > { %353 = vmatpush.bf16.msra.mxu0 %v664_v2  ;;  %691 = vmatpush.bf16.msra.mxu2 %v664_v2  ;;  %v658_v21 = vld [vmem:[%s789_s6 + $0x68] sm:$0xff] }
  0x15   : > { %692 = vmatpush.bf16.msra.mxu3 %v664_v2  ;;  %690 = vmatpush.bf16.msra.mxu1 %v664_v2 }
  0x18   : > { %354 = vmatpush.bf16.msra.mxu0 %v663_v3  ;;  %694 = vmatpush.bf16.msra.mxu2 %v663_v3 }
  0x19   : > { %695 = vmatpush.bf16.msra.mxu3 %v663_v3  ;;  %693 = vmatpush.bf16.msra.mxu1 %v663_v3 }
  0x1c   : > { %355 = vmatpush.bf16.msra.mxu0 %v662_v4  ;;  %697 = vmatpush.bf16.msra.mxu2 %v662_v4 }
  0x1d   : > { %698 = vmatpush.bf16.msra.mxu3 %v662_v4  ;;  %696 = vmatpush.bf16.msra.mxu1 %v662_v4 }
  0x20   : > { %356 = vmatpush.bf16.msra.mxu0 %v661_v5  ;;  %700 = vmatpush.bf16.msra.mxu2 %v661_v5 }
  0x21   : > { %701 = vmatpush.bf16.msra.mxu3 %v661_v5  ;;  %699 = vmatpush.bf16.msra.mxu1 %v661_v5 }
  0x24   : > { %357 = vmatpush.bf16.msra.mxu0 %v660_v6  ;;  %703 = vmatpush.bf16.msra.mxu2 %v660_v6 }
  0x25   : > { %704 = vmatpush.bf16.msra.mxu3 %v660_v6  ;;  %702 = vmatpush.bf16.msra.mxu1 %v660_v6 }
  0x28   : > { %358 = vmatpush.bf16.msra.mxu0 %v659_v7  ;;  %706 = vmatpush.bf16.msra.mxu2 %v659_v7 }
  0x29   : > { %707 = vmatpush.bf16.msra.mxu3 %v659_v7  ;;  %705 = vmatpush.bf16.msra.mxu1 %v659_v7 }
  0x2b   : > { %359 = vmatmul.bf16.vlgmr.msra.gmra.mxu0 %v645_v8  ;;  %389 = vmatmul.bf16.vlgmr.msra.gmra.mxu2 %v651_v9 }
  0x2c   : > { %409 = vmatmul.bf16.vlgmr.msra.gmra.mxu3 %v655_v10  ;;  %374 = vmatmul.bf16.vlgmr.msra.gmra.mxu1 %v648_v11 }
  0x3b   : > { %364 = vmatmul.bf16.gmra.mxu0 %v646_v12  ;;  %394 = vmatmul.bf16.gmra.mxu2 %v652_v13 }
  0x3c   : > { %414 = vmatmul.bf16.gmra.mxu3 %v656_v14  ;;  %379 = vmatmul.bf16.gmra.mxu1 %v649_v15 }
  0x4b   : > { %369 = vmatmul.bf16.gmra.mxu0 %v647_v16  ;;  %399 = vmatmul.bf16.gmra.mxu2 %v653_v17 }
  0x4c   : > { %419 = vmatmul.bf16.gmra.mxu3 %v657_v18  ;;  %384 = vmatmul.bf16.gmra.mxu1 %v650_v19 }
  0x5b   : > { %404 = vmatmul.bf16.gmra.mxu2 %v654_v20 }
  0x5c   : > { %424 = vmatmul.bf16.gmra.mxu3 %v658_v21 }
  0xa8   : > { %v360_v23 = vpop.f32.mrf.mxu0 }
  0xa9   : > { %v805_v22 = vpop.f32.mrf.mxu1  ;;  %v361_v34 = vadd.f32 %v816_v32, %v360_v23 }
  0xab   : > { %v430_v41 = vmax.f32 %v361_v34, 0.0 }
  0xae   : > { %v807_v24 = vpop.f32.mrf.mxu2 }
  0xaf   : > { %v809_v25 = vpop.f32.mrf.mxu3 }
  0xb0   : > { %v362_v29 = vpop.f32.mrf.mxu0 }
  0xb1   : > { %v377_v26 = vpop.f32.mrf.mxu1  ;;  %v363_v38 = vadd.f32 %v816_v32, %v362_v29 }
  0xb2   : > { %v378_v35 = vadd.f32 %v816_v32, %v377_v26 }
  0xb3   : > { %v431_v47 = vmax.f32 %v363_v38, 0.0 }
  0xb4   : > { %v437_v42 = vmax.f32 %v378_v35, 0.0 }
  0xb6   : > { %v811_v27 = vpop.f32.mrf.mxu2  ;;  %v458_v52 = vmax.f32 %v430_v41, %v437_v42  ;;  %v376_v41 = vadd.f32 %v816_v32, %v805_v22  ;;  %v391_v42 = vadd.f32 %v816_v32, %v807_v24 }
  0xb7   : > { %v412_v28 = vpop.f32.mrf.mxu3 }
  0xb8   : > { %v365_v37 = vpop.f32.mrf.mxu0  ;;  %v413_v39 = vadd.f32 %v816_v32, %v412_v28 }
  0xb9   : > { %v380_v30 = vpop.f32.mrf.mxu1  ;;  %v366_v1 = vadd.f32 %v816_v32, %v365_v37 }
  0xba   : > { %v381_v40 = vadd.f32 %v816_v32, %v380_v30  ;;  %v451_v48 = vmax.f32 %v413_v39, 0.0 }
  0xbb   : > { %v432_v7 = vmax.f32 %v366_v1, 0.0 }
  0xbc   : > { %v438_v49 = vmax.f32 %v381_v40, 0.0 }
  0xbe   : > { %v395_v31 = vpop.f32.mrf.mxu2  ;;  %v459_v56 = vmax.f32 %v431_v47, %v438_v49 }
  0xbf   : > { %v415_v33 = vpop.f32.mrf.mxu3  ;;  %v396_v36 = vadd.f32 %v816_v32, %v395_v31 }
  0xc0   : > { %v416_v44 = vadd.f32 %v816_v32, %v415_v33  ;;  %v367_v58 = vpop.f32.mrf.mxu0 }
  0xc1   : > { %v444_v43 = vmax.f32 %v396_v36, 0.0  ;;  %v382_v45 = vpop.f32.mrf.mxu1  ;;  %v368_v4 = vadd.f32 %v816_v32, %v367_v58 }
  0xc2   : > { %v452_v54 = vmax.f32 %v416_v44, 0.0  ;;  %v383_v2 = vadd.f32 %v816_v32, %v382_v45 }
  0xc3   : > { %v465_v53 = vmax.f32 %v444_v43, %v451_v48  ;;  %v433_v13 = vmax.f32 %v368_v4, 0.0  ;;  %v393_v43 = vadd.f32 %v816_v32, %v811_v27  ;;  %v411_v48 = vadd.f32 %v816_v32, %v809_v25 }
  0xc4   : > { %v439_v8 = vmax.f32 %v383_v2, 0.0 }
  0xc5   : > { %v472_v59 = vmax.f32 %v458_v52, %v465_v53  ;;  %v436_v53 = vmax.f32 %v376_v41, 0.0  ;;  %v443_v24 = vmax.f32 %v393_v43, 0.0 }
  0xc6   : > { %v397_v46 = vpop.f32.mrf.mxu2  ;;  %v460_v18 = vmax.f32 %v432_v7, %v439_v8 }
  0xc7   : > { %v398_v50 = vadd.f32 %v816_v32, %v397_v46  ;;  %v417_v51 = vpop.f32.mrf.mxu3 }
  0xc8   : > { %v418_v5 = vadd.f32 %v816_v32, %v417_v51  ;;  %v370_v11 = vpop.f32.mrf.mxu0 }
  0xc9   : > { %v445_v55 = vmax.f32 %v398_v50, 0.0  ;;  %v385_v0 = vpop.f32.mrf.mxu1  ;;  %v371_v36 = vadd.f32 %v816_v32, %v370_v11 }
  0xca   : > { %v386_v6 = vadd.f32 %v816_v32, %v385_v0  ;;  %v453_v14 = vmax.f32 %v418_v5, 0.0 }
  0xcb   : > { %v466_v57 = vmax.f32 %v445_v55, %v452_v54  ;;  %v434_v44 = vmax.f32 %v371_v36, 0.0  ;;  %v442_v54 = vmax.f32 %v391_v42, 0.0 }
  0xcc   : > { %v440_v15 = vmax.f32 %v386_v6, 0.0 }
  0xcd   : > { %v473_v60 = vmax.f32 %v459_v56, %v466_v57 }
  0xce   : > { %v400_v61 = vpop.f32.mrf.mxu2  ;;  %v461_v23 = vmax.f32 %v433_v13, %v440_v15 }
  0xcf   : > { %v670_v62 = vpack.c.bf16 %v473_v60, %v472_v59  ;;  %v420_v63 = vpop.f32.mrf.mxu3  ;;  %v401_v3 = vadd.f32 %v816_v32, %v400_v61  ;;  %v450_v59 = vmax.f32 %v411_v48, 0.0 }
  0xd0   : > { %v421_v10 = vadd.f32 %v816_v32, %v420_v63  ;;  %v372_v35 = vpop.f32.mrf.mxu0 }
  0xd1   : > { %671 = vst [vmem:[%s830_s14] sm:$0xff] %v670_v62   ;;  %v446_v9 = vmax.f32 %v401_v3, 0.0  ;;  %v387_v30 = vpop.f32.mrf.mxu1  ;;  %v373_v39 = vadd.f32 %v816_v32, %v372_v35  ;;  %v464_v62 = vmax.f32 %v436_v53, %v443_v24 }
  0xd2   : > { %v454_v20 = vmax.f32 %v421_v10, 0.0  ;;  %v388_v37 = vadd.f32 %v816_v32, %v387_v30 }
  0xd3   : > { %v467_v19 = vmax.f32 %v446_v9, %v453_v14  ;;  %v435_v50 = vmax.f32 %v373_v39, 0.0 }
  0xd4   : > { %v441_v45 = vmax.f32 %v388_v37, 0.0 }
  0xd5   : > { %v474_v28 = vmax.f32 %v460_v18, %v467_v19  ;;  %v463_v25 = vmax.f32 %v435_v50, %v442_v54 }
  0xd6   : > { %v402_v12 = vpop.f32.mrf.mxu2  ;;  %v462_v27 = vmax.f32 %v434_v44, %v441_v45 }
  0xd7   : > { %v403_v16 = vadd.f32 %v816_v32, %v402_v12  ;;  %v422_v17 = vpop.f32.mrf.mxu3 }
  0xd8   : > { %v423_v40 = vadd.f32 %v816_v32, %v422_v17 }
  0xd9   : > { %v447_v21 = vmax.f32 %v403_v16, 0.0 }
  0xda   : > { %v455_v51 = vmax.f32 %v423_v40, 0.0 }
  0xdb   : > { %v468_v26 = vmax.f32 %v447_v21, %v454_v20 }
  0xdd   : > { %v475_v29 = vmax.f32 %v461_v23, %v468_v26 }
  0xde   : > { %v405_v31 = vpop.f32.mrf.mxu2 }
  0xdf   : > { %v675_v33 = vpack.c.bf16 %v475_v29, %v474_v28  ;;  %v425_v34 = vpop.f32.mrf.mxu3  ;;  %v406_v38 = vadd.f32 %v816_v32, %v405_v31 }
  0xe0   : > { %v426_v47 = vadd.f32 %v816_v32, %v425_v34 }
  0xe1   : > { %682 = vst [vmem:[%s830_s14 + $0x8] sm:$0xff] %v675_v33   ;;  %v448_v46 = vmax.f32 %v406_v38, 0.0 }
  0xe2   : > { %v456_v57 = vmax.f32 %v426_v47, 0.0 }
  0xe3   : > { %v469_v56 = vmax.f32 %v448_v46, %v455_v51 }
  0xe5   : > { %v476_v0 = vmax.f32 %v462_v27, %v469_v56 }
  0xe6   : > { %v407_v49 = vpop.f32.mrf.mxu2 }
  0xe7   : > { %v408_v52 = vadd.f32 %v816_v32, %v407_v49  ;;  %v427_v22 = vpop.f32.mrf.mxu3 }
  0xe8   : > { %v428_v55 = vadd.f32 %v816_v32, %v427_v22 }
  0xe9   : > { %v449_v58 = vmax.f32 %v408_v52, 0.0 }
  0xea   : > { %v457_v60 = vmax.f32 %v428_v55, 0.0 }
  0xeb   : > { %v470_v61 = vmax.f32 %v449_v58, %v456_v57 }
  0xec   : > { %v471_v63 = vmax.f32 %v450_v59, %v457_v60 }
  0xed   : > { %v477_v1 = vmax.f32 %v463_v25, %v470_v61 }
  0xee   : > { %v478_v2 = vmax.f32 %v464_v62, %v471_v63 }
  0xef   : > { %v680_v3 = vpack.c.bf16 %v477_v1, %v476_v0 }
  0xf0   : > { %v485_v4 = vpack.c.bf16 %v478_v2, %v478_v2 }
  0xf1   : > { %683 = vst [vmem:[%s830_s14 + $0x10] sm:$0xff] %v680_v3  }
  0xf2   : > { %492 = vst [vmem:[%s830_s14 + $0x18] sm:$0xf] %v485_v4 }
  0xf3 PF: > { %s13_s12 = sadd.s32 1, %s725_s12  }
  0xf4   : > { %p10_p4 = scmp.ge.s32.totalorder %s13_s12, 4  }
  0xf6   :  { %12 = sbr.rel (!%p10_p4) target bundleno = 1 (0x1), region = 62 }

// kernel: lenet_forward.3
= control target key start
LH: loop header
LB: loop body
LE: loop exit
PB: predicated region body
PF: predicated region fallthrough
CT: control target
= control target key end

     0   :  { %14 = vsyncpa [#allocation4], 0  ;;  %s5994_s0 = inlined_call_operand.vmem [shape: bf16[2,32,3200], index: 0, kind: input, shape index: {}]   ;;  %s5995_s1 = inlined_call_operand.vmem [shape: bf16[3200,128], index: 1, kind: input, shape index: {}]   ;;  %s5996_s2 = inlined_call_operand.vmem [shape: f32[1,128], index: 2, kind: input, shape index: {}]   ;;  %s5997_s3 = inlined_call_operand.vmem [shape: bf16[4,128,128], index: 3, kind: input, shape index: {}]   ;;  %s5998_s4 = inlined_call_operand.vmem [shape: f32[1,128], index: 4, kind: input, shape index: {}]   ;;  %s5999_s5 = inlined_call_operand.vmem [shape: bf16[128,128], index: 5, kind: input, shape index: {}]   ;;  %s6000_s6 = inlined_call_operand.vmem [shape: f32[1,128], index: 6, kind: input, shape index: {}]   ;;  %s6001_s7 = inlined_call_operand.vmem [shape: bf16[128,128], index: 7, kind: input, shape index: {}]   ;;  %s6002_s8 = inlined_call_operand.vmem [shape: f32[1,128], index: 8, kind: input, shape index: {}]   ;;  %s6003_s9 = inlined_call_operand.hbm [shape: f32[2,1,128], index: 9, kind: output, shape index: {}]  }
   0x1   :  { %16 = vsyncpa [#allocation4 + $0x1], 0  ;;  %s4973_s30 = smov 0   ;;  %s4975_s10 = smov 0  }
   0x2   :  { %s4977_s11 = smov 0   ;;  %s4979_s12 = smov 0  }
   0x3 LB: > { %s4994_s13 = sadd.s32 4294967295, %s4921_s12   ;;  %s3273_s14 = sadd.s32 4294967294, %s4921_s12   ;;  %s4921_s12 = sphi %s4979_s12, %s6009_s12   ;;  %s4917_s11 = sphi %s4977_s11, %s6008_s11   ;;  %s4913_s10 = sphi %s4975_s10, %s6007_s10   ;;  %s4909_s30 = sphi %s4973_s30, %s6006_s30  }
   0x4   : > { %s4998_s15 = sadd.s32 1, %s4921_s12   ;;  %s223_s16 = sadd.s32 1, %s4917_s11 }
   0x5   : > { %s220_s17 = ssub.s32 %s4921_s12, %s4998_s15  ;;  %p233_p0 = scmp.ne.s32.totalorder %s4917_s11, %s4913_s10 }
   0x6   : > { %p221_p1 = scmp.eq.s32.totalorder %s220_s17, 0  ;;  %p234_p2 = scmp.eq.s32.totalorder %s4994_s13, 1 }
   0x7   : > { %p239_p3 = scmp.ne.s32.totalorder %s4913_s10, %s4909_s30  ;;  %p240_p4 = scmp.eq.s32.totalorder %s3273_s14, 1 }
   0x8   : > { %s5009_s18 = scalar_select %p221_p1, %s4917_s11, %s223_s16  }
   0x9   : > { %p5011_p5 = por %p234_p2, %p233_p0  ;;  %p5015_p6 = por %p240_p4, %p239_p3 }
   0xa   : > { %p3276_p7 = scmp.ge.s32.totalorder %s4921_s12, 1  ;;  %p290_p8 = scmp.lt.s32.totalorder %s4921_s12, 3 }
   0xc   : > { %p291_p9 = pnand %p3276_p7, %p290_p8 }
   0xd   : > { %p325_p10 = scmp.lt.s32.totalorder (!%p291_p9), %s4994_s13, 1  ;;  %s323_s17 = sand.u32 (!%p291_p9), 1, %s4913_s10  }
   0xe   : > { %294 = sbr.rel (%p291_p9) target bundleno = 827 (0x33b), region = 56  ;;  %s3214_s24 = scalar_lea.hbm (!%p291_p9), %s6003_s9, %s4994_s13 }
   0xf   : > { %s324_s26 = scalar_lea.vmem (!%p291_p9), [#allocation3], %s323_s17  ;;  %s4879_s23 = scalar_lea.hbm (!%p291_p9), %s6003_s9, 2 }
  0x10   : > { %s3216_s27 = sshll.u32 (!%p291_p9), %s324_s26, 4  ;;  %s3217_s27 = int_to_ptr.vmem [resolvable:$true] %s3216_s27 }
  0x13   : > { %v4577_v0 = vld [vmem:[%s5995_s1 + $0x38] sm:$0xff]  ;;  %v4576_v4 = vld [vmem:[%s5995_s1 + $0x30] sm:$0xff]  ;;  %v4575_v8 = vld [vmem:[%s5995_s1 + $0x28] sm:$0xff]  ;;  %s326_s21 = scalar_select %p325_p10, %s4994_s13, 1 }
  0x14   : > { %v4593_v1 = vld [vmem:[%s5995_s1 + $0xb8] sm:$0xff]  ;;  %2238 = vmatpush.bf16.msra.mxu0 %v4577_v0  ;;  %v4592_v5 = vld [vmem:[%s5995_s1 + $0xb0] sm:$0xff]  ;;  %v4591_v9 = vld [vmem:[%s5995_s1 + $0xa8] sm:$0xff] }
  0x15   : > { %v4585_v2 = vld [vmem:[%s5995_s1 + $0x78] sm:$0xff]  ;;  %2276 = vmatpush.bf16.msra.mxu2 %v4593_v1  ;;  %v4584_v6 = vld [vmem:[%s5995_s1 + $0x70] sm:$0xff]  ;;  %v4583_v10 = vld [vmem:[%s5995_s1 + $0x68] sm:$0xff]  ;;  %s4818_s14 = smul.u32 400, %s326_s21  ;;  %s3206_s21 = scalar_lea.sflag [#allocation4], %s323_s17 }
  0x16   : > { %v4601_v3 = vld [vmem:[%s5995_s1 + $0xf8] sm:$0xff]  ;;  %2257 = vmatpush.bf16.msra.mxu1 %v4585_v2  ;;  %v4600_v7 = vld [vmem:[%s5995_s1 + $0xf0] sm:$0xff]  ;;  %v4599_v11 = vld [vmem:[%s5995_s1 + $0xe8] sm:$0xff] }
  0x17   : > { %2295 = vmatpush.bf16.msra.mxu3 %v4601_v3  ;;  %v4574_v12 = vld [vmem:[%s5995_s1 + $0x20] sm:$0xff]  ;;  %v4573_v16 = vld [vmem:[%s5995_s1 + $0x18] sm:$0xff]  ;;  %v4572_v20 = vld [vmem:[%s5995_s1 + $0x10] sm:$0xff]  ;;  %s5104_s29 = scalar_lea.vmem %s5994_s0, %s4818_s14 }
  0x18   : > { %2239 = vmatpush.bf16.msra.mxu0 %v4576_v4  ;;  %v4590_v13 = vld [vmem:[%s5995_s1 + $0xa0] sm:$0xff]  ;;  %v4589_v17 = vld [vmem:[%s5995_s1 + $0x98] sm:$0xff]  ;;  %v4588_v21 = vld [vmem:[%s5995_s1 + $0x90] sm:$0xff] }
  0x19   : > { %2277 = vmatpush.bf16.msra.mxu2 %v4592_v5  ;;  %v4582_v14 = vld [vmem:[%s5995_s1 + $0x60] sm:$0xff]  ;;  %v4581_v18 = vld [vmem:[%s5995_s1 + $0x58] sm:$0xff]  ;;  %v4580_v22 = vld [vmem:[%s5995_s1 + $0x50] sm:$0xff] }
  0x1a   : > { %2258 = vmatpush.bf16.msra.mxu1 %v4584_v6  ;;  %v4598_v15 = vld [vmem:[%s5995_s1 + $0xe0] sm:$0xff]  ;;  %v4597_v19 = vld [vmem:[%s5995_s1 + $0xd8] sm:$0xff]  ;;  %v4596_v23 = vld [vmem:[%s5995_s1 + $0xd0] sm:$0xff] }
  0x1b   : > { %2296 = vmatpush.bf16.msra.mxu3 %v4600_v7  ;;  %v4571_v24 = vld [vmem:[%s5995_s1 + $0x8] sm:$0xff]  ;;  %v4570_v28 = vld [vmem:[%s5995_s1] sm:$0xff]  ;;  %v3290_v39 = vld [vmem:[%s5104_s29 + $0x6c] sm:$0xf0] }
  0x1c   : > { %2240 = vmatpush.bf16.msra.mxu0 %v4575_v8  ;;  %v4587_v25 = vld [vmem:[%s5995_s1 + $0x88] sm:$0xff]  ;;  %v4586_v29 = vld [vmem:[%s5995_s1 + $0x80] sm:$0xff]  ;;  %v4609_v40 = vld [vmem:[%s5995_s1 + $0x138] sm:$0xff] }
  0x1d   : > { %2278 = vmatpush.bf16.msra.mxu2 %v4591_v9  ;;  %v4579_v26 = vld [vmem:[%s5995_s1 + $0x48] sm:$0xff]  ;;  %v4578_v30 = vld [vmem:[%s5995_s1 + $0x40] sm:$0xff]  ;;  %v4625_v41 = vld [vmem:[%s5995_s1 + $0x1b8] sm:$0xff] }
  0x1e   : > { %2259 = vmatpush.bf16.msra.mxu1 %v4583_v10  ;;  %v4595_v27 = vld [vmem:[%s5995_s1 + $0xc8] sm:$0xff]  ;;  %v4594_v31 = vld [vmem:[%s5995_s1 + $0xc0] sm:$0xff]  ;;  %v4617_v46 = vld [vmem:[%s5995_s1 + $0x178] sm:$0xff] }
  0x1f   : > { %2297 = vmatpush.bf16.msra.mxu3 %v4599_v11  ;;  %v3280_v32 = vld [vmem:[%s5104_s29] sm:$0xf]  ;;  %v4532_v33 = vld [vmem:[%s5104_s29 + $0x60] sm:$0xf0]  ;;  %v3288_v34 = vld [vmem:[%s5104_s29 + $0x8] sm:$0xf] }
  0x20   : > { %2241 = vmatpush.bf16.msra.mxu0 %v4574_v12  ;;  %v4533_v35 = vld [vmem:[%s5104_s29 + $0x68] sm:$0xf0]  ;;  %v4520_v36 = vld [vmem:[%s5104_s29 + $0x4] sm:$0xf]  ;;  %v3282_v37 = vld [vmem:[%s5104_s29 + $0x64] sm:$0xf0]  ;;  %v3281_v42 = vor.u32 %v4532_v33, %v3280_v32 }
  0x21   : > { %2279 = vmatpush.bf16.msra.mxu2 %v4590_v13  ;;  %v4521_v38 = vld [vmem:[%s5104_s29 + $0xc] sm:$0xf]  ;;  %v3289_v43 = vor.u32 %v4533_v35, %v3288_v34  ;;  %v3285_v44 = vor.u32 %v4520_v36, %v3282_v37  ;;  %v4633_v47 = vld [vmem:[%s5995_s1 + $0x1f8] sm:$0xff]  ;;  %v4608_v48 = vld [vmem:[%s5995_s1 + $0x130] sm:$0xff] }
  0x22   : > { %2260 = vmatpush.bf16.msra.mxu1 %v4582_v14  ;;  %v3293_v45 = vor.u32 %v4521_v38, %v3290_v39  ;;  %v4624_v49 = vld [vmem:[%s5995_s1 + $0x1b0] sm:$0xff]  ;;  %v4607_v52 = vld [vmem:[%s5995_s1 + $0x128] sm:$0xff]  ;;  %v4606_v56 = vld [vmem:[%s5995_s1 + $0x120] sm:$0xff] }
  0x23   : > { %2298 = vmatpush.bf16.msra.mxu3 %v4598_v15  ;;  %v4616_v50 = vld [vmem:[%s5995_s1 + $0x170] sm:$0xff]  ;;  %v4623_v53 = vld [vmem:[%s5995_s1 + $0x1a8] sm:$0xff]  ;;  %v4622_v57 = vld [vmem:[%s5995_s1 + $0x1a0] sm:$0xff] }
  0x24   : > { %2242 = vmatpush.bf16.msra.mxu0 %v4573_v16  ;;  %v4632_v51 = vld [vmem:[%s5995_s1 + $0x1f0] sm:$0xff]  ;;  %v4615_v54 = vld [vmem:[%s5995_s1 + $0x168] sm:$0xff]  ;;  %v4614_v58 = vld [vmem:[%s5995_s1 + $0x160] sm:$0xff] }
  0x25   : > { %2280 = vmatpush.bf16.msra.mxu2 %v4589_v17  ;;  %v4631_v55 = vld [vmem:[%s5995_s1 + $0x1e8] sm:$0xff]  ;;  %v4630_v59 = vld [vmem:[%s5995_s1 + $0x1e0] sm:$0xff]  ;;  %v3388_v62 = vld [vmem:[%s5104_s29 + $0xd0] sm:$0xf] }
  0x26   : > { %2261 = vmatpush.bf16.msra.mxu1 %v4581_v18  ;;  %v3380_v60 = vld [vmem:[%s5104_s29 + $0xc8] sm:$0xf]  ;;  %v4557_v61 = vld [vmem:[%s5104_s29 + $0x128] sm:$0xf0]  ;;  %v4558_v63 = vld [vmem:[%s5104_s29 + $0x130] sm:$0xf0] }
  0x27   : > { %2299 = vmatpush.bf16.msra.mxu3 %v4597_v19  ;;  %v4545_v0 = vld [vmem:[%s5104_s29 + $0xcc] sm:$0xf]  ;;  %v3382_v1 = vld [vmem:[%s5104_s29 + $0x12c] sm:$0xf0]  ;;  %v4546_v2 = vld [vmem:[%s5104_s29 + $0xd4] sm:$0xf]  ;;  %v3381_v6 = vor.u32 %v4557_v61, %v3380_v60  ;;  %v3389_v7 = vor.u32 %v4558_v63, %v3388_v62 }
  0x28   : > { %2243 = vmatpush.bf16.msra.mxu0 %v4572_v20  ;;  %v3390_v3 = vld [vmem:[%s5104_s29 + $0x134] sm:$0xf0]  ;;  %v3385_v8 = vor.u32 %v4545_v0, %v3382_v1  ;;  %v4604_v12 = vld [vmem:[%s5995_s1 + $0x110] sm:$0xff]  ;;  %v4603_v16 = vld [vmem:[%s5995_s1 + $0x108] sm:$0xff] }
  0x29   : > { %2281 = vmatpush.bf16.msra.mxu2 %v4588_v21  ;;  %v4605_v4 = vld [vmem:[%s5995_s1 + $0x118] sm:$0xff]  ;;  %v3393_v9 = vor.u32 %v4546_v2, %v3390_v3  ;;  %v4620_v13 = vld [vmem:[%s5995_s1 + $0x190] sm:$0xff]  ;;  %v4619_v17 = vld [vmem:[%s5995_s1 + $0x188] sm:$0xff] }
  0x2a   : > { %2262 = vmatpush.bf16.msra.mxu1 %v4580_v22  ;;  %v4621_v5 = vld [vmem:[%s5995_s1 + $0x198] sm:$0xff]  ;;  %v4612_v14 = vld [vmem:[%s5995_s1 + $0x150] sm:$0xff]  ;;  %v4611_v18 = vld [vmem:[%s5995_s1 + $0x148] sm:$0xff] }
  0x2b   : > { %2300 = vmatpush.bf16.msra.mxu3 %v4596_v23  ;;  %v4613_v10 = vld [vmem:[%s5995_s1 + $0x158] sm:$0xff]  ;;  %v4628_v15 = vld [vmem:[%s5995_s1 + $0x1d0] sm:$0xff]  ;;  %v4627_v19 = vld [vmem:[%s5995_s1 + $0x1c8] sm:$0xff] }
  0x2c   : > { %2244 = vmatpush.bf16.msra.mxu0 %v4571_v24  ;;  %v4629_v11 = vld [vmem:[%s5995_s1 + $0x1d8] sm:$0xff]  ;;  %v4602_v20 = vld [vmem:[%s5995_s1 + $0x100] sm:$0xff]  ;;  %v3296_v22 = vld [vmem:[%s5104_s29 + $0x10] sm:$0xf] }
  0x2d   : > { %2282 = vmatpush.bf16.msra.mxu2 %v4587_v25  ;;  %v4618_v21 = vld [vmem:[%s5995_s1 + $0x180] sm:$0xff]  ;;  %v4534_v25 = vld [vmem:[%s5104_s29 + $0x70] sm:$0xf0]  ;;  %v4523_v32 = vld [vmem:[%s5104_s29 + $0x1c] sm:$0xf] }
  0x2e   : > { %2263 = vmatpush.bf16.msra.mxu1 %v4579_v26  ;;  %v4610_v23 = vld [vmem:[%s5995_s1 + $0x140] sm:$0xff]  ;;  %v4641_v26 = vld [vmem:[%s5995_s1 + $0x238] sm:$0xff]  ;;  %v3297_v36 = vor.u32 %v4534_v25, %v3296_v22  ;;  %v3406_v61 = vld [vmem:[%s5104_s29 + $0x144] sm:$0xf0] }
  0x2f   : > { %2301 = vmatpush.bf16.msra.mxu3 %v4595_v27  ;;  %v4626_v24 = vld [vmem:[%s5995_s1 + $0x1c0] sm:$0xff]  ;;  %v4657_v27 = vld [vmem:[%s5995_s1 + $0x2b8] sm:$0xff]  ;;  %v3314_v25 = vld [vmem:[%s5104_s29 + $0x84] sm:$0xf0] }
  0x30   : > { %2245 = vmatpush.bf16.msra.mxu0 %v4570_v28  ;;  %v3304_v28 = vld [vmem:[%s5104_s29 + $0x18] sm:$0xf]  ;;  %v3306_v33 = vld [vmem:[%s5104_s29 + $0x7c] sm:$0xf0]  ;;  %v4548_v60 = vld [vmem:[%s5104_s29 + $0xe4] sm:$0xf] }
  0x31   : > { %2283 = vmatpush.bf16.msra.mxu2 %v4586_v29  ;;  %v4535_v29 = vld [vmem:[%s5104_s29 + $0x78] sm:$0xf0]  ;;  %v3309_v39 = vor.u32 %v4523_v32, %v3306_v33  ;;  %v3409_v3 = vor.u32 %v4548_v60, %v3406_v61  ;;  %v4524_v22 = vld [vmem:[%s5104_s29 + $0x24] sm:$0xf]  ;;  %v4672_v32 = vld [vmem:[%s5995_s1 + $0x330] sm:$0xff] }
  0x32   : > { %2264 = vmatpush.bf16.msra.mxu1 %v4578_v30  ;;  %v4522_v30 = vld [vmem:[%s5104_s29 + $0x14] sm:$0xf]  ;;  %v4649_v34 = vld [vmem:[%s5995_s1 + $0x278] sm:$0xff]  ;;  %v3305_v37 = vor.u32 %v4535_v29, %v3304_v28 }
  0x33   : > { %2302 = vmatpush.bf16.msra.mxu3 %v4594_v31  ;;  %2246 = vmatmul.bf16.vlgmr.msra.gmra.mxu0 %v3281_v42  ;;  %v3298_v31 = vld [vmem:[%s5104_s29 + $0x74] sm:$0xf0]  ;;  %v4648_v42 = vld [vmem:[%s5995_s1 + $0x270] sm:$0xff] }
  0x34   : > { %2314 = vmatpush.bf16.msrb.mxu0 %v4609_v40  ;;  %2284 = vmatmul.bf16.vlgmr.msra.gmra.mxu2 %v3289_v43  ;;  %v4665_v35 = vld [vmem:[%s5995_s1 + $0x2f8] sm:$0xff]  ;;  %v3301_v38 = vor.u32 %v4522_v30, %v3298_v31  ;;  %v4640_v40 = vld [vmem:[%s5995_s1 + $0x230] sm:$0xff]  ;;  %v3317_v30 = vor.u32 %v4524_v22, %v3314_v25 }
  0x35   : > { %2352 = vmatpush.bf16.msrb.mxu2 %v4625_v41  ;;  %2265 = vmatmul.bf16.vlgmr.msra.gmra.mxu1 %v3285_v44  ;;  %v4656_v41 = vld [vmem:[%s5995_s1 + $0x2b0] sm:$0xff]  ;;  %v4639_v44 = vld [vmem:[%s5995_s1 + $0x228] sm:$0xff]  ;;  %v4645_v62 = vld [vmem:[%s5995_s1 + $0x258] sm:$0xff] }
  0x36   : > { %2303 = vmatmul.bf16.vlgmr.msra.gmra.mxu3 %v3293_v45  ;;  %2333 = vmatpush.bf16.msrb.mxu1 %v4617_v46  ;;  %v4664_v43 = vld [vmem:[%s5995_s1 + $0x2f0] sm:$0xff]  ;;  %v4655_v45 = vld [vmem:[%s5995_s1 + $0x2a8] sm:$0xff]  ;;  %v4661_v63 = vld [vmem:[%s5995_s1 + $0x2d8] sm:$0xff] }
  0x37   : > { %2371 = vmatpush.bf16.msrb.mxu3 %v4633_v47  ;;  %v4647_v46 = vld [vmem:[%s5995_s1 + $0x268] sm:$0xff]  ;;  %v4688_v33 = vld [vmem:[%s5995_s1 + $0x3b0] sm:$0xff] }
  0x38   : > { %2315 = vmatpush.bf16.msrb.mxu0 %v4608_v48  ;;  %v4663_v47 = vld [vmem:[%s5995_s1 + $0x2e8] sm:$0xff]  ;;  %v4638_v48 = vld [vmem:[%s5995_s1 + $0x220] sm:$0xff]  ;;  %v4668_v60 = vld [vmem:[%s5995_s1 + $0x310] sm:$0xff] }
  0x39   : > { %2353 = vmatpush.bf16.msrb.mxu2 %v4624_v49  ;;  %v4654_v49 = vld [vmem:[%s5995_s1 + $0x2a0] sm:$0xff]  ;;  %v4684_v61 = vld [vmem:[%s5995_s1 + $0x390] sm:$0xff] }
  0x3a   : > { %2334 = vmatpush.bf16.msrb.mxu1 %v4616_v50  ;;  %v4646_v50 = vld [vmem:[%s5995_s1 + $0x260] sm:$0xff]  ;;  %v4720_v25 = vld [vmem:[%s5995_s1 + $0x4b0] sm:$0xff] }
  0x3b   : > { %2372 = vmatpush.bf16.msrb.mxu3 %v4632_v51  ;;  %v4662_v51 = vld [vmem:[%s5995_s1 + $0x2e0] sm:$0xff] }
  0x3c   : > { %2316 = vmatpush.bf16.msrb.mxu0 %v4607_v52  ;;  %v3396_v52 = vld [vmem:[%s5104_s29 + $0xd8] sm:$0xf] }
  0x3d   : > { %2354 = vmatpush.bf16.msrb.mxu2 %v4623_v53  ;;  %v4559_v53 = vld [vmem:[%s5104_s29 + $0x138] sm:$0xf0] }
  0x3e   : > { %2335 = vmatpush.bf16.msrb.mxu1 %v4615_v54  ;;  %v3404_v54 = vld [vmem:[%s5104_s29 + $0xe0] sm:$0xf]  ;;  %v3397_v0 = vor.u32 %v4559_v53, %v3396_v52  ;;  %v4550_v52 = vld [vmem:[%s5104_s29 + $0xf4] sm:$0xf]  ;;  %v3422_v53 = vld [vmem:[%s5104_s29 + $0x154] sm:$0xf0] }
  0x3f   : > { %2373 = vmatpush.bf16.msrb.mxu3 %v4631_v55  ;;  %v4560_v55 = vld [vmem:[%s5104_s29 + $0x140] sm:$0xf0] }
  0x40   : > { %2317 = vmatpush.bf16.msrb.mxu0 %v4606_v56  ;;  %v4637_v56 = vld [vmem:[%s5995_s1 + $0x218] sm:$0xff]  ;;  %v3405_v1 = vor.u32 %v4560_v55, %v3404_v54 }
  0x41   : > { %2355 = vmatpush.bf16.msrb.mxu2 %v4622_v57  ;;  %v4653_v57 = vld [vmem:[%s5995_s1 + $0x298] sm:$0xff] }
  0x42   : > { %2336 = vmatpush.bf16.msrb.mxu1 %v4614_v58  ;;  %v4547_v58 = vld [vmem:[%s5104_s29 + $0xdc] sm:$0xf] }
  0x43   : > { %2374 = vmatpush.bf16.msrb.mxu3 %v4630_v59  ;;  %2251 = vmatmul.bf16.gmra.mxu0 %v3381_v6  ;;  %v3398_v59 = vld [vmem:[%s5104_s29 + $0x13c] sm:$0xf0]  ;;  %v4644_v6 = vld [vmem:[%s5995_s1 + $0x250] sm:$0xff]  ;;  %v4677_v54 = vld [vmem:[%s5995_s1 + $0x358] sm:$0xff] }
  0x44   : > { %2318 = vmatpush.bf16.msrb.mxu0 %v4605_v4  ;;  %2289 = vmatmul.bf16.gmra.mxu2 %v3389_v7  ;;  %v3401_v2 = vor.u32 %v4547_v58, %v3398_v59  ;;  %v4636_v4 = vld [vmem:[%s5995_s1 + $0x210] sm:$0xff]  ;;  %v4693_v55 = vld [vmem:[%s5995_s1 + $0x3d8] sm:$0xff]  ;;  %v3425_v59 = vor.u32 %v4550_v52, %v3422_v53 }
  0x45   : > { %2356 = vmatpush.bf16.msrb.mxu2 %v4621_v5  ;;  %2270 = vmatmul.bf16.gmra.mxu1 %v3385_v8  ;;  %v4652_v5 = vld [vmem:[%s5995_s1 + $0x290] sm:$0xff]  ;;  %v4635_v8 = vld [vmem:[%s5995_s1 + $0x208] sm:$0xff] }
  0x46   : > { %2308 = vmatmul.bf16.gmra.mxu3 %v3393_v9  ;;  %2337 = vmatpush.bf16.msrb.mxu1 %v4613_v10  ;;  %v4660_v7 = vld [vmem:[%s5995_s1 + $0x2d0] sm:$0xff]  ;;  %v4651_v9 = vld [vmem:[%s5995_s1 + $0x288] sm:$0xff] }
  0x47   : > { %2375 = vmatpush.bf16.msrb.mxu3 %v4629_v11  ;;  %v4643_v10 = vld [vmem:[%s5995_s1 + $0x248] sm:$0xff]  ;;  %v4700_v52 = vld [vmem:[%s5995_s1 + $0x410] sm:$0xff] }
  0x48   : > { %2319 = vmatpush.bf16.msrb.mxu0 %v4604_v12  ;;  %v4659_v11 = vld [vmem:[%s5995_s1 + $0x2c8] sm:$0xff]  ;;  %v4634_v12 = vld [vmem:[%s5995_s1 + $0x200] sm:$0xff]  ;;  %v4716_v53 = vld [vmem:[%s5995_s1 + $0x490] sm:$0xff] }
  0x49   : > { %2357 = vmatpush.bf16.msrb.mxu2 %v4620_v13  ;;  %v4650_v13 = vld [vmem:[%s5995_s1 + $0x280] sm:$0xff] }
  0x4a   : > { %2338 = vmatpush.bf16.msrb.mxu1 %v4612_v14  ;;  %v4642_v14 = vld [vmem:[%s5995_s1 + $0x240] sm:$0xff] }
  0x4b   : > { %2376 = vmatpush.bf16.msrb.mxu3 %v4628_v15  ;;  %v4658_v15 = vld [vmem:[%s5995_s1 + $0x2c0] sm:$0xff] }
  0x4c   : > { %2320 = vmatpush.bf16.msrb.mxu0 %v4603_v16  ;;  %v3312_v16 = vld [vmem:[%s5104_s29 + $0x20] sm:$0xf] }
  0x4d   : > { %2358 = vmatpush.bf16.msrb.mxu2 %v4619_v17  ;;  %v4536_v17 = vld [vmem:[%s5104_s29 + $0x80] sm:$0xf0] }
  0x4e   : > { %2339 = vmatpush.bf16.msrb.mxu1 %v4611_v18  ;;  %v3320_v18 = vld [vmem:[%s5104_s29 + $0x28] sm:$0xf]  ;;  %v3313_v28 = vor.u32 %v4536_v17, %v3312_v16  ;;  %v4729_v16 = vld [vmem:[%s5995_s1 + $0x4f8] sm:$0xff] }
  0x4f   : > { %2377 = vmatpush.bf16.msrb.mxu3 %v4627_v19  ;;  %v4537_v19 = vld [vmem:[%s5104_s29 + $0x88] sm:$0xf0]  ;;  %v3330_v17 = vld [vmem:[%s5104_s29 + $0x94] sm:$0xf0] }
  0x50   : > { %2321 = vmatpush.bf16.msrb.mxu0 %v4602_v20  ;;  %v4673_v20 = vld [vmem:[%s5995_s1 + $0x338] sm:$0xff]  ;;  %v3321_v29 = vor.u32 %v4537_v19, %v3320_v18  ;;  %v3338_v19 = vld [vmem:[%s5104_s29 + $0x9c] sm:$0xf0] }
  0x51   : > { %2359 = vmatpush.bf16.msrb.mxu2 %v4618_v21  ;;  %v4689_v21 = vld [vmem:[%s5995_s1 + $0x3b8] sm:$0xff] }
  0x52   : > { %2340 = vmatpush.bf16.msrb.mxu1 %v4610_v23  ;;  %v4681_v23 = vld [vmem:[%s5995_s1 + $0x378] sm:$0xff] }
  0x53   : > { %2378 = vmatpush.bf16.msrb.mxu3 %v4626_v24  ;;  %2322 = vmatmul.bf16.vlgmr.msrb.gmra.mxu0 %v3297_v36  ;;  %v4697_v24 = vld [vmem:[%s5995_s1 + $0x3f8] sm:$0xff]  ;;  %v4671_v36 = vld [vmem:[%s5995_s1 + $0x328] sm:$0xff] }
  0x54   : > { %2390 = vmatpush.bf16.msra.mxu0 %v4641_v26  ;;  %2360 = vmatmul.bf16.vlgmr.msrb.gmra.mxu2 %v3305_v37  ;;  %v4525_v26 = vld [vmem:[%s5104_s29 + $0x2c] sm:$0xf]  ;;  %v4527_v18 = vld [vmem:[%s5104_s29 + $0x3c] sm:$0xf] }
  0x55   : > { %2428 = vmatpush.bf16.msra.mxu2 %v4657_v27  ;;  %2341 = vmatmul.bf16.vlgmr.msrb.gmra.mxu1 %v3301_v38  ;;  %v3322_v27 = vld [vmem:[%s5104_s29 + $0x8c] sm:$0xf0]  ;;  %v4687_v37 = vld [vmem:[%s5995_s1 + $0x3a8] sm:$0xff] }
  0x56   : > { %2409 = vmatpush.bf16.msra.mxu1 %v4649_v34  ;;  %2379 = vmatmul.bf16.vlgmr.msrb.gmra.mxu3 %v3309_v39  ;;  %v3325_v31 = vor.u32 %v4525_v26, %v3322_v27  ;;  %v4680_v34 = vld [vmem:[%s5995_s1 + $0x370] sm:$0xff]  ;;  %v4679_v38 = vld [vmem:[%s5995_s1 + $0x368] sm:$0xff] }
  0x57   : > { %2447 = vmatpush.bf16.msra.mxu3 %v4665_v35  ;;  %v4696_v35 = vld [vmem:[%s5995_s1 + $0x3f0] sm:$0xff]  ;;  %v4695_v39 = vld [vmem:[%s5995_s1 + $0x3e8] sm:$0xff] }
  0x58   : > { %2391 = vmatpush.bf16.msra.mxu0 %v4640_v40  ;;  %v4670_v40 = vld [vmem:[%s5995_s1 + $0x320] sm:$0xff]  ;;  %v4712_v26 = vld [vmem:[%s5995_s1 + $0x470] sm:$0xff] }
  0x59   : > { %2429 = vmatpush.bf16.msra.mxu2 %v4656_v41  ;;  %v4686_v41 = vld [vmem:[%s5995_s1 + $0x3a0] sm:$0xff]  ;;  %v4728_v27 = vld [vmem:[%s5995_s1 + $0x4f0] sm:$0xff] }
  0x5a   : > { %2410 = vmatpush.bf16.msra.mxu1 %v4648_v42  ;;  %v4678_v42 = vld [vmem:[%s5995_s1 + $0x360] sm:$0xff] }
  0x5b   : > { %2448 = vmatpush.bf16.msra.mxu3 %v4664_v43  ;;  %v4694_v43 = vld [vmem:[%s5995_s1 + $0x3e0] sm:$0xff] }
  0x5c   : > { %2392 = vmatpush.bf16.msra.mxu0 %v4639_v44  ;;  %v3412_v44 = vld [vmem:[%s5104_s29 + $0xe8] sm:$0xf] }
  0x5d   : > { %2430 = vmatpush.bf16.msra.mxu2 %v4655_v45  ;;  %v4561_v45 = vld [vmem:[%s5104_s29 + $0x148] sm:$0xf0] }
  0x5e   : > { %2411 = vmatpush.bf16.msra.mxu1 %v4647_v46  ;;  %v3420_v46 = vld [vmem:[%s5104_s29 + $0xf0] sm:$0xf] }
  0x5f   : > { %2449 = vmatpush.bf16.msra.mxu3 %v4663_v47  ;;  %v4562_v47 = vld [vmem:[%s5104_s29 + $0x150] sm:$0xf0] }
  0x60   : > { %2393 = vmatpush.bf16.msra.mxu0 %v4638_v48  ;;  %v4669_v48 = vld [vmem:[%s5995_s1 + $0x318] sm:$0xff] }
  0x61   : > { %2431 = vmatpush.bf16.msra.mxu2 %v4654_v49  ;;  %v4685_v49 = vld [vmem:[%s5995_s1 + $0x398] sm:$0xff] }
  0x62   : > { %2412 = vmatpush.bf16.msra.mxu1 %v4646_v50  ;;  %v4549_v50 = vld [vmem:[%s5104_s29 + $0xec] sm:$0xf] }
  0x63   : > { %2450 = vmatpush.bf16.msra.mxu3 %v4662_v51  ;;  %2327 = vmatmul.bf16.gmra.mxu0 %v3397_v0  ;;  %v3414_v51 = vld [vmem:[%s5104_s29 + $0x14c] sm:$0xf0]  ;;  %v4667_v0 = vld [vmem:[%s5995_s1 + $0x308] sm:$0xff] }
  0x64   : > { %2394 = vmatpush.bf16.msra.mxu0 %v4637_v56  ;;  %2365 = vmatmul.bf16.gmra.mxu2 %v3405_v1  ;;  %v3413_v56 = vor.u32 %v4561_v45, %v3412_v44  ;;  %v3417_v58 = vor.u32 %v4549_v50, %v3414_v51  ;;  %v4683_v1 = vld [vmem:[%s5995_s1 + $0x388] sm:$0xff]  ;;  %v4552_v44 = vld [vmem:[%s5104_s29 + $0x104] sm:$0xf] }
  0x65   : > { %2432 = vmatpush.bf16.msra.mxu2 %v4653_v57  ;;  %2346 = vmatmul.bf16.gmra.mxu1 %v3401_v2  ;;  %v3421_v57 = vor.u32 %v4562_v47, %v3420_v46  ;;  %v4675_v2 = vld [vmem:[%s5995_s1 + $0x348] sm:$0xff]  ;;  %v4709_v46 = vld [vmem:[%s5995_s1 + $0x458] sm:$0xff] }
  0x66   : > { %2413 = vmatpush.bf16.msra.mxu1 %v4645_v62  ;;  %2384 = vmatmul.bf16.gmra.mxu3 %v3409_v3  ;;  %v4676_v62 = vld [vmem:[%s5995_s1 + $0x350] sm:$0xff]  ;;  %v4691_v3 = vld [vmem:[%s5995_s1 + $0x3c8] sm:$0xff]  ;;  %v4725_v47 = vld [vmem:[%s5995_s1 + $0x4d8] sm:$0xff] }
  0x67   : > { %2451 = vmatpush.bf16.msra.mxu3 %v4661_v63  ;;  %v4692_v63 = vld [vmem:[%s5995_s1 + $0x3d0] sm:$0xff]  ;;  %v3438_v45 = vld [vmem:[%s5104_s29 + $0x164] sm:$0xf0] }
  0x68   : > { %2395 = vmatpush.bf16.msra.mxu0 %v4636_v4  ;;  %v4666_v4 = vld [vmem:[%s5995_s1 + $0x300] sm:$0xff]  ;;  %v3441_v51 = vor.u32 %v4552_v44, %v3438_v45  ;;  %v4749_v44 = vld [vmem:[%s5995_s1 + $0x598] sm:$0xff]  ;;  %v4553_v45 = vld [vmem:[%s5104_s29 + $0x10c] sm:$0xf] }
  0x69   : > { %2433 = vmatpush.bf16.msra.mxu2 %v4652_v5  ;;  %v4682_v5 = vld [vmem:[%s5995_s1 + $0x380] sm:$0xff] }
  0x6a   : > { %2414 = vmatpush.bf16.msra.mxu1 %v4644_v6  ;;  %v4674_v6 = vld [vmem:[%s5995_s1 + $0x340] sm:$0xff] }
  0x6b   : > { %2452 = vmatpush.bf16.msra.mxu3 %v4660_v7  ;;  %v4690_v7 = vld [vmem:[%s5995_s1 + $0x3c0] sm:$0xff] }
  0x6c   : > { %2396 = vmatpush.bf16.msra.mxu0 %v4635_v8  ;;  %v3328_v8 = vld [vmem:[%s5104_s29 + $0x30] sm:$0xf] }
  0x6d   : > { %2434 = vmatpush.bf16.msra.mxu2 %v4651_v9  ;;  %v4538_v9 = vld [vmem:[%s5104_s29 + $0x90] sm:$0xf0] }
  0x6e   : > { %2415 = vmatpush.bf16.msra.mxu1 %v4643_v10  ;;  %v3336_v10 = vld [vmem:[%s5104_s29 + $0x38] sm:$0xf] }
  0x6f   : > { %2453 = vmatpush.bf16.msra.mxu3 %v4659_v11  ;;  %v4539_v11 = vld [vmem:[%s5104_s29 + $0x98] sm:$0xf0] }
  0x70   : > { %2397 = vmatpush.bf16.msra.mxu0 %v4634_v12  ;;  %v4705_v12 = vld [vmem:[%s5995_s1 + $0x438] sm:$0xff] }
  0x71   : > { %2435 = vmatpush.bf16.msra.mxu2 %v4650_v13  ;;  %v4721_v13 = vld [vmem:[%s5995_s1 + $0x4b8] sm:$0xff] }
  0x72   : > { %2416 = vmatpush.bf16.msra.mxu1 %v4642_v14  ;;  %v4526_v14 = vld [vmem:[%s5104_s29 + $0x34] sm:$0xf] }
  0x73   : > { %2454 = vmatpush.bf16.msra.mxu3 %v4658_v15  ;;  %2398 = vmatmul.bf16.vlgmr.msra.gmra.mxu0 %v3313_v28  ;;  %v4713_v15 = vld [vmem:[%s5995_s1 + $0x478] sm:$0xff]  ;;  %v3333_v22 = vor.u32 %v4526_v14, %v3330_v17  ;;  %v4703_v28 = vld [vmem:[%s5995_s1 + $0x428] sm:$0xff] }
  0x74   : > { %2466 = vmatpush.bf16.msrb.mxu0 %v4673_v20  ;;  %2436 = vmatmul.bf16.vlgmr.msra.gmra.mxu2 %v3321_v29  ;;  %v3329_v20 = vor.u32 %v4538_v9, %v3328_v8  ;;  %v4719_v29 = vld [vmem:[%s5995_s1 + $0x4a8] sm:$0xff]  ;;  %v4745_v8 = vld [vmem:[%s5995_s1 + $0x578] sm:$0xff] }
  0x75   : > { %2504 = vmatpush.bf16.msrb.mxu2 %v4689_v21  ;;  %2417 = vmatmul.bf16.vlgmr.msra.gmra.mxu1 %v3317_v30  ;;  %v3337_v21 = vor.u32 %v4539_v11, %v3336_v10  ;;  %v4711_v30 = vld [vmem:[%s5995_s1 + $0x468] sm:$0xff]  ;;  %v4761_v9 = vld [vmem:[%s5995_s1 + $0x5f8] sm:$0xff] }
  0x76   : > { %2485 = vmatpush.bf16.msrb.mxu1 %v4681_v23  ;;  %2455 = vmatmul.bf16.vlgmr.msra.gmra.mxu3 %v3325_v31  ;;  %v3341_v23 = vor.u32 %v4527_v18, %v3338_v19  ;;  %v4727_v31 = vld [vmem:[%s5995_s1 + $0x4e8] sm:$0xff] }
  0x77   : > { %2523 = vmatpush.bf16.msrb.mxu3 %v4697_v24  ;;  %v4704_v24 = vld [vmem:[%s5995_s1 + $0x430] sm:$0xff]  ;;  %v3346_v10 = vld [vmem:[%s5104_s29 + $0xa4] sm:$0xf0]  ;;  %v4529_v11 = vld [vmem:[%s5104_s29 + $0x4c] sm:$0xf] }
  0x78   : > { %2467 = vmatpush.bf16.msrb.mxu0 %v4672_v32  ;;  %v4702_v32 = vld [vmem:[%s5995_s1 + $0x420] sm:$0xff] }
  0x79   : > { %2505 = vmatpush.bf16.msrb.mxu2 %v4688_v33  ;;  %v4718_v33 = vld [vmem:[%s5995_s1 + $0x4a0] sm:$0xff] }
  0x7a   : > { %2486 = vmatpush.bf16.msrb.mxu1 %v4680_v34  ;;  %v4710_v34 = vld [vmem:[%s5995_s1 + $0x460] sm:$0xff] }
  0x7b   : > { %2524 = vmatpush.bf16.msrb.mxu3 %v4696_v35  ;;  %v4726_v35 = vld [vmem:[%s5995_s1 + $0x4e0] sm:$0xff] }
  0x7c   : > { %2468 = vmatpush.bf16.msrb.mxu0 %v4671_v36  ;;  %v3428_v36 = vld [vmem:[%s5104_s29 + $0xf8] sm:$0xf] }
  0x7d   : > { %2506 = vmatpush.bf16.msrb.mxu2 %v4687_v37  ;;  %v4563_v37 = vld [vmem:[%s5104_s29 + $0x158] sm:$0xf0] }
  0x7e   : > { %2487 = vmatpush.bf16.msrb.mxu1 %v4679_v38  ;;  %v3436_v38 = vld [vmem:[%s5104_s29 + $0x100] sm:$0xf] }
  0x7f   : > { %2525 = vmatpush.bf16.msrb.mxu3 %v4695_v39  ;;  %v4564_v39 = vld [vmem:[%s5104_s29 + $0x160] sm:$0xf0] }
  0x80   : > { %2469 = vmatpush.bf16.msrb.mxu0 %v4670_v40  ;;  %v4701_v40 = vld [vmem:[%s5995_s1 + $0x418] sm:$0xff] }
  0x81   : > { %2507 = vmatpush.bf16.msrb.mxu2 %v4686_v41  ;;  %v4717_v41 = vld [vmem:[%s5995_s1 + $0x498] sm:$0xff] }
  0x82   : > { %2488 = vmatpush.bf16.msrb.mxu1 %v4678_v42  ;;  %v4551_v42 = vld [vmem:[%s5104_s29 + $0xfc] sm:$0xf] }
  0x83   : > { %2526 = vmatpush.bf16.msrb.mxu3 %v4694_v43  ;;  %2403 = vmatmul.bf16.gmra.mxu0 %v3413_v56  ;;  %v3430_v43 = vld [vmem:[%s5104_s29 + $0x15c] sm:$0xf0]  ;;  %v4699_v56 = vld [vmem:[%s5995_s1 + $0x408] sm:$0xff] }
  0x84   : > { %2470 = vmatpush.bf16.msrb.mxu0 %v4669_v48  ;;  %2441 = vmatmul.bf16.gmra.mxu2 %v3421_v57  ;;  %v3429_v48 = vor.u32 %v4563_v37, %v3428_v36  ;;  %v3433_v50 = vor.u32 %v4551_v42, %v3430_v43  ;;  %v4715_v57 = vld [vmem:[%s5995_s1 + $0x488] sm:$0xff]  ;;  %v4750_v36 = vld [vmem:[%s5995_s1 + $0x5a0] sm:$0xff]  ;;  %v4566_v42 = vld [vmem:[%s5104_s29 + $0x170] sm:$0xf0] }
  0x85   : > { %2508 = vmatpush.bf16.msrb.mxu2 %v4685_v49  ;;  %2422 = vmatmul.bf16.gmra.mxu1 %v3417_v58  ;;  %v3437_v49 = vor.u32 %v4564_v39, %v3436_v38  ;;  %v4707_v58 = vld [vmem:[%s5995_s1 + $0x448] sm:$0xff]  ;;  %v4742_v37 = vld [vmem:[%s5995_s1 + $0x560] sm:$0xff]  ;;  %v4733_v43 = vld [vmem:[%s5995_s1 + $0x518] sm:$0xff] }
  0x86   : > { %2489 = vmatpush.bf16.msrb.mxu1 %v4677_v54  ;;  %2460 = vmatmul.bf16.gmra.mxu3 %v3425_v59  ;;  %v4708_v54 = vld [vmem:[%s5995_s1 + $0x450] sm:$0xff]  ;;  %v4723_v59 = vld [vmem:[%s5995_s1 + $0x4c8] sm:$0xff]  ;;  %v4758_v38 = vld [vmem:[%s5995_s1 + $0x5e0] sm:$0xff] }
  0x87   : > { %2527 = vmatpush.bf16.msrb.mxu3 %v4693_v55  ;;  %v4724_v55 = vld [vmem:[%s5995_s1 + $0x4d0] sm:$0xff]  ;;  %v3444_v39 = vld [vmem:[%s5104_s29 + $0x108] sm:$0xf] }
  0x88   : > { %2471 = vmatpush.bf16.msrb.mxu0 %v4668_v60  ;;  %v4698_v60 = vld [vmem:[%s5995_s1 + $0x400] sm:$0xff] }
  0x89   : > { %2509 = vmatpush.bf16.msrb.mxu2 %v4684_v61  ;;  %v4714_v61 = vld [vmem:[%s5995_s1 + $0x480] sm:$0xff] }
  0x8a   : > { %2490 = vmatpush.bf16.msrb.mxu1 %v4676_v62  ;;  %v4706_v62 = vld [vmem:[%s5995_s1 + $0x440] sm:$0xff] }
  0x8b   : > { %2528 = vmatpush.bf16.msrb.mxu3 %v4692_v63  ;;  %v4722_v63 = vld [vmem:[%s5995_s1 + $0x4c0] sm:$0xff] }
  0x8c   : > { %2472 = vmatpush.bf16.msrb.mxu0 %v4667_v0  ;;  %v3344_v0 = vld [vmem:[%s5104_s29 + $0x40] sm:$0xf] }
  0x8d   : > { %2510 = vmatpush.bf16.msrb.mxu2 %v4683_v1  ;;  %v4540_v1 = vld [vmem:[%s5104_s29 + $0xa0] sm:$0xf0] }
  0x8e   : > { %2491 = vmatpush.bf16.msrb.mxu1 %v4675_v2  ;;  %v3352_v2 = vld [vmem:[%s5104_s29 + $0x48] sm:$0xf] }
  0x8f   : > { %2529 = vmatpush.bf16.msrb.mxu3 %v4691_v3  ;;  %v5578_v3 = vld [vmem:[%s5996_s2] ss:$0 sm:$0xff] }
  0x90   : > { %2473 = vmatpush.bf16.msrb.mxu0 %v4666_v4  ;;  %v4541_v4 = vld [vmem:[%s5104_s29 + $0xa8] sm:$0xf0] }
  0x91   : > { %2511 = vmatpush.bf16.msrb.mxu2 %v4682_v5  ;;  %v4737_v5 = vld [vmem:[%s5995_s1 + $0x538] sm:$0xff]  ;;  %v3353_v14 = vor.u32 %v4541_v4, %v3352_v2  ;;  %v4747_v2 = vld [vmem:[%s5995_s1 + $0x588] sm:$0xff] }
  0x92   : > { %2492 = vmatpush.bf16.msrb.mxu1 %v4674_v6  ;;  %v4753_v6 = vld [vmem:[%s5995_s1 + $0x5b8] sm:$0xff] }
  0x93   : > { %2530 = vmatpush.bf16.msrb.mxu3 %v4690_v7  ;;  %2474 = vmatmul.bf16.vlgmr.msrb.gmra.mxu0 %v3329_v20  ;;  %v4528_v7 = vld [vmem:[%s5104_s29 + $0x44] sm:$0xf]  ;;  %v4736_v20 = vld [vmem:[%s5995_s1 + $0x530] sm:$0xff] }
  0x94   : > { %2542 = vmatpush.bf16.msra.mxu0 %v4705_v12  ;;  %2512 = vmatmul.bf16.vlgmr.msrb.gmra.mxu2 %v3337_v21  ;;  %v3354_v12 = vld [vmem:[%s5104_s29 + $0xac] sm:$0xf0] }
  0x95   : > { %2580 = vmatpush.bf16.msra.mxu2 %v4721_v13  ;;  %2493 = vmatmul.bf16.vlgmr.msrb.gmra.mxu1 %v3333_v22  ;;  %v3345_v13 = vor.u32 %v4540_v1, %v3344_v0  ;;  %v3357_v17 = vor.u32 %v4529_v11, %v3354_v12  ;;  %v4752_v21 = vld [vmem:[%s5995_s1 + $0x5b0] sm:$0xff]  ;;  %v4731_v1 = vld [vmem:[%s5995_s1 + $0x508] sm:$0xff] }
  0x96   : > { %2561 = vmatpush.bf16.msra.mxu1 %v4713_v15  ;;  %2531 = vmatmul.bf16.vlgmr.msrb.gmra.mxu3 %v3341_v23  ;;  %v4744_v22 = vld [vmem:[%s5995_s1 + $0x570] sm:$0xff] }
  0x97   : > { %2599 = vmatpush.bf16.msra.mxu3 %v4729_v16  ;;  %v3349_v16 = vor.u32 %v4528_v7, %v3346_v10  ;;  %v4760_v23 = vld [vmem:[%s5995_s1 + $0x5f0] sm:$0xff] }
  0x98   : > { %2543 = vmatpush.bf16.msra.mxu0 %v4704_v24 }
  0x99   : > { %2581 = vmatpush.bf16.msra.mxu2 %v4720_v25  ;;  %v4735_v25 = vld [vmem:[%s5995_s1 + $0x528] sm:$0xff] }
  0x9a   : > { %2562 = vmatpush.bf16.msra.mxu1 %v4712_v26  ;;  %v4751_v26 = vld [vmem:[%s5995_s1 + $0x5a8] sm:$0xff] }
  0x9b   : > { %2600 = vmatpush.bf16.msra.mxu3 %v4728_v27 }
  0x9c   : > { %2544 = vmatpush.bf16.msra.mxu0 %v4703_v28  ;;  %v4743_v28 = vld [vmem:[%s5995_s1 + $0x568] sm:$0xff] }
  0x9d   : > { %2582 = vmatpush.bf16.msra.mxu2 %v4719_v29  ;;  %v4759_v29 = vld [vmem:[%s5995_s1 + $0x5e8] sm:$0xff] }
  0x9e   : > { %2563 = vmatpush.bf16.msra.mxu1 %v4711_v30 }
  0x9f   : > { %2601 = vmatpush.bf16.msra.mxu3 %v4727_v31 }
  0xa0   : > { %2545 = vmatpush.bf16.msra.mxu0 %v4702_v32 }
  0xa1   : > { %2583 = vmatpush.bf16.msra.mxu2 %v4718_v33 }
  0xa2   : > { %2564 = vmatpush.bf16.msra.mxu1 %v4710_v34 }
  0xa3   : > { %2602 = vmatpush.bf16.msra.mxu3 %v4726_v35  ;;  %2479 = vmatmul.bf16.gmra.mxu0 %v3429_v48  ;;  %v4734_v35 = vld [vmem:[%s5995_s1 + $0x520] sm:$0xff]  ;;  %v3454_v48 = vld [vmem:[%s5104_s29 + $0x174] sm:$0xf0] }
  0xa4   : > { %2546 = vmatpush.bf16.msra.mxu0 %v4701_v40  ;;  %2517 = vmatmul.bf16.gmra.mxu2 %v3437_v49  ;;  %v4565_v40 = vld [vmem:[%s5104_s29 + $0x168] sm:$0xf0] }
  0xa5   : > { %2584 = vmatpush.bf16.msra.mxu2 %v4717_v41  ;;  %2498 = vmatmul.bf16.gmra.mxu1 %v3433_v50  ;;  %v3452_v41 = vld [vmem:[%s5104_s29 + $0x110] sm:$0xf]  ;;  %v4741_v50 = vld [vmem:[%s5995_s1 + $0x558] sm:$0xff] }
  0xa6   : > { %2565 = vmatpush.bf16.msra.mxu1 %v4709_v46  ;;  %2536 = vmatmul.bf16.gmra.mxu3 %v3441_v51  ;;  %v3446_v46 = vld [vmem:[%s5104_s29 + $0x16c] sm:$0xf0]  ;;  %v4757_v51 = vld [vmem:[%s5995_s1 + $0x5d8] sm:$0xff] }
  0xa7   : > { %2603 = vmatpush.bf16.msra.mxu3 %v4725_v47  ;;  %v4554_v47 = vld [vmem:[%s5104_s29 + $0x114] sm:$0xf] }
  0xa8   : > { %2547 = vmatpush.bf16.msra.mxu0 %v4700_v52 }
  0xa9   : > { %2585 = vmatpush.bf16.msra.mxu2 %v4716_v53  ;;  %v3445_v53 = vor.u32 %v4565_v40, %v3444_v39 }
  0xaa   : > { %2566 = vmatpush.bf16.msra.mxu1 %v4708_v54  ;;  %v3453_v54 = vor.u32 %v4566_v42, %v3452_v41  ;;  %v4768_v41 = vld [vmem:[%s5995_s1 + $0x630] sm:$0xff] }
  0xab   : > { %2604 = vmatpush.bf16.msra.mxu3 %v4724_v55 }
  0xac   : > { %2548 = vmatpush.bf16.msra.mxu0 %v4699_v56  ;;  %v3449_v56 = vor.u32 %v4553_v45, %v3446_v46 }
  0xad   : > { %2586 = vmatpush.bf16.msra.mxu2 %v4715_v57  ;;  %v3457_v57 = vor.u32 %v4554_v47, %v3454_v48 }
  0xae   : > { %2567 = vmatpush.bf16.msra.mxu1 %v4707_v58 }
  0xaf   : > { %2605 = vmatpush.bf16.msra.mxu3 %v4723_v59 }
  0xb0   : > { %2549 = vmatpush.bf16.msra.mxu0 %v4698_v60  ;;  %v2247_v15 = vpop.f32.mrf.mxu0  ;;  %v4732_v60 = vld [vmem:[%s5995_s1 + $0x510] sm:$0xff] }
  0xb1   : > { %2587 = vmatpush.bf16.msra.mxu2 %v4714_v61  ;;  %v2248_v18 = vadd.f32 %v5578_v3, %v2247_v15  ;;  %v4748_v61 = vld [vmem:[%s5995_s1 + $0x590] sm:$0xff]  ;;  %v4738_v15 = vld [vmem:[%s5995_s1 + $0x540] sm:$0xff] }
  0xb2   : > { %2568 = vmatpush.bf16.msra.mxu1 %v4706_v62  ;;  %v2266_v19 = vpop.f32.mrf.mxu1  ;;  %v4740_v62 = vld [vmem:[%s5995_s1 + $0x550] sm:$0xff] }
  0xb3   : > { %2606 = vmatpush.bf16.msra.mxu3 %v4722_v63  ;;  %v2267_v24 = vadd.f32 %v2266_v19, %v2248_v18  ;;  %2550 = vmatmul.bf16.vlgmr.msra.gmra.mxu0 %v3345_v13  ;;  %v4756_v63 = vld [vmem:[%s5995_s1 + $0x5d0] sm:$0xff]  ;;  %v4730_v13 = vld [vmem:[%s5995_s1 + $0x500] sm:$0xff]  ;;  %v4769_v19 = vld [vmem:[%s5995_s1 + $0x638] sm:$0xff] }
  0xb4   : > { %2618 = vmatpush.bf16.msrb.mxu0 %v4737_v5  ;;  %2588 = vmatmul.bf16.vlgmr.msra.gmra.mxu2 %v3353_v14  ;;  %v4739_v5 = vld [vmem:[%s5995_s1 + $0x548] sm:$0xff]  ;;  %v4746_v14 = vld [vmem:[%s5995_s1 + $0x580] sm:$0xff]  ;;  %v4542_v18 = vld [vmem:[%s5104_s29 + $0xb0] sm:$0xf0] }
  0xb5   : > { %2656 = vmatpush.bf16.msrb.mxu2 %v4753_v6  ;;  %2569 = vmatmul.bf16.vlgmr.msra.gmra.mxu1 %v3349_v16  ;;  %v4755_v6 = vld [vmem:[%s5995_s1 + $0x5c8] sm:$0xff]  ;;  %v4754_v16 = vld [vmem:[%s5995_s1 + $0x5c0] sm:$0xff] }
  0xb6   : > { %2637 = vmatpush.bf16.msrb.mxu1 %v4745_v8  ;;  %2607 = vmatmul.bf16.vlgmr.msra.gmra.mxu3 %v3357_v17  ;;  %v3360_v17 = vld [vmem:[%s5104_s29 + $0x50] sm:$0xf] }
  0xb7   : > { %2675 = vmatpush.bf16.msrb.mxu3 %v4761_v9  ;;  %v2285_v27 = vpop.f32.mrf.mxu2 }
  0xb8   : > { %2619 = vmatpush.bf16.msrb.mxu0 %v4736_v20  ;;  %v2286_v30 = vadd.f32 %v2285_v27, %v2267_v24  ;;  %v5622_v32 = vpop.f32.mrf.mxu0  ;;  %v3368_v20 = vld [vmem:[%s5104_s29 + $0x58] sm:$0xf]  ;;  %v3370_v27 = vld [vmem:[%s5104_s29 + $0xbc] sm:$0xf0] }
  0xb9   : > { %2657 = vmatpush.bf16.msrb.mxu2 %v4752_v21  ;;  %v2304_v31 = vpop.f32.mrf.mxu3  ;;  %v4543_v21 = vld [vmem:[%s5104_s29 + $0xb8] sm:$0xf0] }
  0xba   : > { %2638 = vmatpush.bf16.msrb.mxu1 %v4744_v22  ;;  %v5624_v33 = vadd.f32 %v2304_v31, %v2286_v30  ;;  %v5626_v34 = vpop.f32.mrf.mxu1  ;;  %v4530_v22 = vld [vmem:[%s5104_s29 + $0x54] sm:$0xf]  ;;  %v3361_v31 = vor.u32 %v4542_v18, %v3360_v17 }
  0xbb   : > { %2676 = vmatpush.bf16.msrb.mxu3 %v4760_v23  ;;  %v2250_v23 = vadd.f32 %v5578_v3, %v5622_v32 }
  0xbc   : > { %2620 = vmatpush.bf16.msrb.mxu0 %v4735_v25  ;;  %v3362_v25 = vld [vmem:[%s5104_s29 + $0xb4] sm:$0xf0] }
  0xbd   : > { %2658 = vmatpush.bf16.msrb.mxu2 %v4751_v26  ;;  %v4531_v26 = vld [vmem:[%s5104_s29 + $0x5c] sm:$0xf]  ;;  %v2269_v39 = vadd.f32 %v5626_v34, %v2250_v23  ;;  %v4544_v23 = vld [vmem:[%s5104_s29 + $0xc0] sm:$0xf0] }
  0xbe   : > { %2639 = vmatpush.bf16.msrb.mxu1 %v4743_v28 }
  0xbf   : > { %2677 = vmatpush.bf16.msrb.mxu3 %v4759_v29  ;;  %v5654_v49 = vpop.f32.mrf.mxu2 }
  0xc0   : > { %2621 = vmatpush.bf16.msrb.mxu0 %v4734_v35  ;;  %v2252_v55 = vpop.f32.mrf.mxu0  ;;  %v3369_v35 = vor.u32 %v4543_v21, %v3368_v20  ;;  %v2288_v42 = vadd.f32 %v5654_v49, %v2269_v39  ;;  %v4762_v20 = vld [vmem:[%s5995_s1 + $0x600] sm:$0xff] }
  0xc1   : > { %2659 = vmatpush.bf16.msrb.mxu2 %v4750_v36  ;;  %v5662_v52 = vpop.f32.mrf.mxu3  ;;  %v2253_v58 = vadd.f32 %v5578_v3, %v2252_v55  ;;  %v4567_v55 = vld [vmem:[%s5104_s29 + $0x178] sm:$0xf0] }
  0xc2   : > { %2640 = vmatpush.bf16.msrb.mxu1 %v4742_v37  ;;  %v2271_v59 = vpop.f32.mrf.mxu1  ;;  %v3365_v37 = vor.u32 %v4530_v22, %v3362_v25  ;;  %v3376_v22 = vld [vmem:[%s5104_s29 + $0x60] sm:$0xf] }
  0xc3   : > { %2678 = vmatpush.bf16.msrb.mxu3 %v4758_v38  ;;  %v2272_v0 = vadd.f32 %v2271_v59, %v2253_v58  ;;  %2555 = vmatmul.bf16.gmra.mxu0 %v3445_v53  ;;  %v3373_v38 = vor.u32 %v4531_v26, %v3370_v27  ;;  %v4555_v58 = vld [vmem:[%s5104_s29 + $0x11c] sm:$0xf]  ;;  %v3462_v59 = vld [vmem:[%s5104_s29 + $0x17c] sm:$0xf0]  ;;  %v3377_v27 = vor.u32 %v4544_v23, %v3376_v22 }
  0xc4   : > { %2622 = vmatpush.bf16.msrb.mxu0 %v4733_v43  ;;  %2593 = vmatmul.bf16.gmra.mxu2 %v3453_v54  ;;  %v3460_v54 = vld [vmem:[%s5104_s29 + $0x118] sm:$0xf] }
  0xc5   : > { %2660 = vmatpush.bf16.msrb.mxu2 %v4749_v44  ;;  %2574 = vmatmul.bf16.gmra.mxu1 %v3449_v56  ;;  %v2307_v44 = vadd.f32 %v5662_v52, %v2288_v42  ;;  %v3468_v56 = vld [vmem:[%s5104_s29 + $0x120] sm:$0xf]  ;;  %v4765_v52 = vld [vmem:[%s5995_s1 + $0x618] sm:$0xff]  ;;  %v3476_v42 = vld [vmem:[%s5104_s29 + $0x128] sm:$0xf] }
  0xc6   : > { %2641 = vmatpush.bf16.msrb.mxu1 %v4741_v50  ;;  %2612 = vmatmul.bf16.gmra.mxu3 %v3457_v57  ;;  %v4568_v57 = vld [vmem:[%s5104_s29 + $0x180] sm:$0xf0] }
  0xc7   : > { %2679 = vmatpush.bf16.msrb.mxu3 %v4757_v51  ;;  %v2290_v4 = vpop.f32.mrf.mxu2  ;;  %v4766_v51 = vld [vmem:[%s5995_s1 + $0x620] sm:$0xff] }
  0xc8   : > { %2623 = vmatpush.bf16.msrb.mxu0 %v4732_v60  ;;  %v2291_v7 = vadd.f32 %v2290_v4, %v2272_v0  ;;  %v2254_v9 = vpop.f32.mrf.mxu0  ;;  %v4556_v60 = vld [vmem:[%s5104_s29 + $0x124] sm:$0xf] }
  0xc9   : > { %2661 = vmatpush.bf16.msrb.mxu2 %v4748_v61  ;;  %v2309_v8 = vpop.f32.mrf.mxu3  ;;  %v2255_v10 = vadd.f32 %v5578_v3, %v2254_v9  ;;  %v3470_v61 = vld [vmem:[%s5104_s29 + $0x184] sm:$0xf0] }
  0xca   : > { %2642 = vmatpush.bf16.msrb.mxu1 %v4740_v62  ;;  %v5690_v11 = vadd.f32 %v2309_v8, %v2291_v7  ;;  %v2273_v12 = vpop.f32.mrf.mxu1 }
  0xcb   : > { %2680 = vmatpush.bf16.msrb.mxu3 %v4756_v63  ;;  %v2274_v24 = vadd.f32 %v2273_v12, %v2255_v10  ;;  %v4764_v10 = vld [vmem:[%s5995_s1 + $0x610] sm:$0xff] }
  0xcc   : > { %2624 = vmatpush.bf16.msrb.mxu0 %v4731_v1  ;;  %v3461_v1 = vor.u32 %v4567_v55, %v3460_v54 }
  0xcd   : > { %2662 = vmatpush.bf16.msrb.mxu2 %v4747_v2  ;;  %v3469_v2 = vor.u32 %v4568_v57, %v3468_v56 }
  0xce   : > { %2643 = vmatpush.bf16.msrb.mxu1 %v4739_v5  ;;  %v3465_v5 = vor.u32 %v4555_v58, %v3462_v59 }
  0xcf   : > { %2681 = vmatpush.bf16.msrb.mxu3 %v4755_v6  ;;  %v2292_v28 = vpop.f32.mrf.mxu2  ;;  %v3473_v6 = vor.u32 %v4556_v60, %v3470_v61 }
  0xd0   : > { %2625 = vmatpush.bf16.msrb.mxu0 %v4730_v13  ;;  %v2293_v29 = vadd.f32 %v2292_v28, %v2274_v24  ;;  %v2323_v36 = vpop.f32.mrf.mxu0  ;;  %v4763_v13 = vld [vmem:[%s5995_s1 + $0x608] sm:$0xff] }
  0xd1   : > { %2663 = vmatpush.bf16.msrb.mxu2 %v4746_v14  ;;  %v2311_v30 = vpop.f32.mrf.mxu3  ;;  %v2324_v32 = vadd.f32 %v2323_v36, %v5624_v33  ;;  %v4767_v33 = vld [vmem:[%s5995_s1 + $0x628] sm:$0xff] }
  0xd2   : > { %2644 = vmatpush.bf16.msrb.mxu1 %v4738_v15  ;;  %v2312_v3 = vadd.f32 %v2311_v30, %v2293_v29  ;;  %v2342_v40 = vpop.f32.mrf.mxu1 }
  0xd3   : > { %2682 = vmatpush.bf16.msrb.mxu3 %v4754_v16  ;;  %v2343_v43 = vadd.f32 %v2342_v40, %v2324_v32  ;;  %2626 = vmatmul.bf16.vlgmr.msrb.gmra.mxu0 %v3361_v31 }
  0xd4   : > { %2694 = vmatpush.bf16.msra.mxu0 %v4769_v19  ;;  %2664 = vmatmul.bf16.vlgmr.msrb.gmra.mxu2 %v3369_v35 }
  0xd5   : > { %2645 = vmatmul.bf16.vlgmr.msrb.gmra.mxu1 %v3365_v37 }
  0xd6   : > { %2683 = vmatmul.bf16.vlgmr.msrb.gmra.mxu3 %v3373_v38 }
  0xd7   : > { %v2361_v34 = vpop.f32.mrf.mxu2 }
  0xd8   : > { %2695 = vmatpush.bf16.msra.mxu0 %v4768_v41  ;;  %v2362_v45 = vadd.f32 %v2361_v34, %v2343_v43  ;;  %v2325_v47 = vpop.f32.mrf.mxu0  ;;  %v4569_v43 = vld [vmem:[%s5104_s29 + $0x188] sm:$0xf0]  ;;  %s3218_s29 = sshll.u32 %s3214_s24, 4  ;;  %s3219_s29 = int_to_ptr.hbm [resolvable:$true] %s3218_s29 }
  0xd9   : > { %v2380_v46 = vpop.f32.mrf.mxu3  ;;  %v2326_v48 = vadd.f32 %v2325_v47, %v2307_v44  ;;  %s4873_s28 = sshra.s32 %s3219_s29, 4  ;;  %s4874_s28 = int_to_ptr.hbm [resolvable:$true] %s4873_s28 }
  0xda   : > { %v2381_v49 = vadd.f32 %v2380_v46, %v2362_v45  ;;  %v2344_v50 = vpop.f32.mrf.mxu1  ;;  %v3477_v45 = vor.u32 %v4569_v43, %v3476_v42  ;;  %s4875_s16 = scalar_lea.hbm %s4874_s28, 1  ;;  %p4880_p0 = scmp.lt.s32.totalorder %s4874_s28, %s6003_s9 }
  0xdb   : > { %v2345_v53 = vadd.f32 %v2344_v50, %v2326_v48  ;;  %p4876_p11 = scmp.ne.s32.totalorder %s4874_s28, %s4875_s16  ;;  %p4881_p1 = scmp.lt.s32.totalorder %s4879_s23, %s4875_s16 }
  0xdc   : > { %2696 = vmatpush.bf16.msra.mxu0 %v4767_v33 }
  0xdd   : > { %p4877_p12 = pnand %p4876_p11, %p5011_p5  ;;  %p4882_p2 = por %p4881_p1, %p4880_p0 }
  0xdf   : > { %v2363_v62 = vpop.f32.mrf.mxu2  ;;  %p4878_p13 = pneg %p4877_p12 }
  0xe0   : > { %2697 = vmatpush.bf16.msra.mxu0 %v4766_v51  ;;  %v2364_v63 = vadd.f32 %v2363_v62, %v2345_v53  ;;  %v2328_v4 = vpop.f32.mrf.mxu0 }
  0xe1   : > { %v2382_v0 = vpop.f32.mrf.mxu3  ;;  %v2329_v7 = vadd.f32 %v2328_v4, %v5690_v11  ;;  %p4883_p3 = pnand %p4882_p2, %p4878_p13 }
  0xe2   : > { %v2383_v8 = vadd.f32 %v2382_v0, %v2364_v63  ;;  %v2347_v9 = vpop.f32.mrf.mxu1 }
  0xe3   : > { %v2348_v12 = vadd.f32 %v2347_v9, %v2329_v7  ;;  %2631 = vmatmul.bf16.gmra.mxu0 %v3461_v1 }
  0xe4   : > { %2698 = vmatpush.bf16.msra.mxu0 %v4765_v52  ;;  %2669 = vmatmul.bf16.gmra.mxu2 %v3469_v2 }
  0xe5   : > { %2650 = vmatmul.bf16.gmra.mxu1 %v3465_v5 }
  0xe6   : > { %2688 = vmatmul.bf16.gmra.mxu3 %v3473_v6 }
  0xe7   : > { %v2366_v11 = vpop.f32.mrf.mxu2 }
  0xe8   : > { %2699 = vmatpush.bf16.msra.mxu0 %v4764_v10  ;;  %v2367_v14 = vadd.f32 %v2366_v11, %v2348_v12  ;;  %v2330_v16 = vpop.f32.mrf.mxu0 }
  0xe9   : > { %v2385_v15 = vpop.f32.mrf.mxu3  ;;  %v2331_v17 = vadd.f32 %v2330_v16, %v2312_v3 }
  0xea   : > { %v2386_v18 = vadd.f32 %v2385_v15, %v2367_v14  ;;  %v2349_v19 = vpop.f32.mrf.mxu1 }
  0xeb   : > { %v2350_v21 = vadd.f32 %v2349_v19, %v2331_v17 }
  0xec   : > { %2700 = vmatpush.bf16.msra.mxu0 %v4763_v13 }
  0xef   : > { %v2368_v24 = vpop.f32.mrf.mxu2 }
  0xf0   : > { %2701 = vmatpush.bf16.msra.mxu0 %v4762_v20  ;;  %v2369_v25 = vadd.f32 %v2368_v24, %v2350_v21  ;;  %v2399_v28 = vpop.f32.mrf.mxu0 }
  0xf1   : > { %v2387_v26 = vpop.f32.mrf.mxu3  ;;  %v2400_v30 = vadd.f32 %v2399_v28, %v2381_v49 }
  0xf2   : > { %v2388_v29 = vadd.f32 %v2387_v26, %v2369_v25  ;;  %v2418_v31 = vpop.f32.mrf.mxu1 }
  0xf3   : > { %v2419_v35 = vadd.f32 %v2418_v31, %v2400_v30  ;;  %2702 = vmatmul.bf16.vlgmr.msra.gmra.mxu0 %v3377_v27 }
  0xf7   : > { %v2437_v36 = vpop.f32.mrf.mxu2 }
  0xf8   : > { %v2438_v37 = vadd.f32 %v2437_v36, %v2419_v35  ;;  %v2401_v39 = vpop.f32.mrf.mxu0 }
  0xf9   : > { %v2456_v38 = vpop.f32.mrf.mxu3  ;;  %v2402_v3 = vadd.f32 %v2401_v39, %v2383_v8 }
  0xfa   : > { %v2457_v32 = vadd.f32 %v2456_v38, %v2438_v37  ;;  %v2420_v40 = vpop.f32.mrf.mxu1 }
  0xfb   : > { %v2421_v41 = vadd.f32 %v2420_v40, %v2402_v3 }
  0xff   : > { %v2439_v33 = vpop.f32.mrf.mxu2 }
 0x100   : > { %v2440_v34 = vadd.f32 %v2439_v33, %v2421_v41  ;;  %v2404_v46 = vpop.f32.mrf.mxu0 }
 0x101   : > { %v2458_v44 = vpop.f32.mrf.mxu3  ;;  %v2405_v47 = vadd.f32 %v2404_v46, %v2386_v18  ;;  %v4793_v46 = vld [vmem:[%s5997_s3 + $0xb8] sm:$0xff] }
 0x102   : > { %v2459_v48 = vadd.f32 %v2458_v44, %v2440_v34  ;;  %v2423_v49 = vpop.f32.mrf.mxu1  ;;  %v4777_v44 = vld [vmem:[%s5997_s3 + $0x38] sm:$0xff]  ;;  %2947 = vmatpush.bf16.msra.mxu3 %v4793_v46  ;;  %v4778_v46 = vld [vmem:[%s5997_s3 + $0x40] sm:$0xff] }
 0x103   : > { %v2424_v50 = vadd.f32 %v2423_v49, %v2405_v47  ;;  %2707 = vmatmul.bf16.gmra.mxu0 %v3477_v45  ;;  %v4785_v45 = vld [vmem:[%s5997_s3 + $0x78] sm:$0xff]  ;;  %2867 = vmatpush.bf16.msra.mxu2 %v4777_v44  ;;  %v4776_v49 = vld [vmem:[%s5997_s3 + $0x30] sm:$0xff] }
 0x104   : > { %v4801_v47 = vld [vmem:[%s5997_s3 + $0xf8] sm:$0xff]  ;;  %2806 = vmatpush.bf16.msra.mxu1 %v4785_v45  ;;  %v4770_v45 = vld [vmem:[%s5997_s3] sm:$0xff] }
 0x105   : > { %3028 = vmatpush.bf16.msrb.mxu0 %v4801_v47 }
 0x107   : > { %v2442_v51 = vpop.f32.mrf.mxu2  ;;  %2868 = vmatpush.bf16.msra.mxu2 %v4776_v49 }
 0x108   : > { %v2443_v53 = vadd.f32 %v2442_v51, %v2424_v50  ;;  %v2406_v55 = vpop.f32.mrf.mxu0  ;;  %v4784_v50 = vld [vmem:[%s5997_s3 + $0x70] sm:$0xff] }
 0x109   : > { %v2461_v54 = vpop.f32.mrf.mxu3  ;;  %v2407_v56 = vadd.f32 %v2406_v55, %v2388_v29  ;;  %v4792_v51 = vld [vmem:[%s5997_s3 + $0xb0] sm:$0xff]  ;;  %2807 = vmatpush.bf16.msra.mxu1 %v4784_v50 }
 0x10a   : > { %v2462_v57 = vadd.f32 %v2461_v54, %v2443_v53  ;;  %v2425_v52 = vpop.f32.mrf.mxu1  ;;  %v4800_v53 = vld [vmem:[%s5997_s3 + $0xf0] sm:$0xff]  ;;  %2948 = vmatpush.bf16.msra.mxu3 %v4792_v51  ;;  %v4794_v51 = vld [vmem:[%s5997_s3 + $0xc0] sm:$0xff] }
 0x10b   : > { %v2426_v58 = vadd.f32 %v2425_v52, %v2407_v56  ;;  %3029 = vmatpush.bf16.msrb.mxu0 %v4800_v53  ;;  %v4783_v52 = vld [vmem:[%s5997_s3 + $0x68] sm:$0xff] }
 0x10d   : > { %2808 = vmatpush.bf16.msra.mxu1 %v4783_v52 }
 0x10f   : > { %v2444_v59 = vpop.f32.mrf.mxu2 }
 0x110   : > { %v2445_v60 = vadd.f32 %v2444_v59, %v2426_v58  ;;  %v2475_v62 = vpop.f32.mrf.mxu0  ;;  %v4791_v58 = vld [vmem:[%s5997_s3 + $0xa8] sm:$0xff] }
 0x111   : > { %v2463_v61 = vpop.f32.mrf.mxu3  ;;  %v2476_v0 = vadd.f32 %v2475_v62, %v2457_v32  ;;  %2949 = vmatpush.bf16.msra.mxu3 %v4791_v58 }
 0x112   : > { %v2464_v63 = vadd.f32 %v2463_v61, %v2445_v60  ;;  %v2494_v1 = vpop.f32.mrf.mxu1  ;;  %v4799_v60 = vld [vmem:[%s5997_s3 + $0xe8] sm:$0xff]  ;;  %v4774_v61 = vld [vmem:[%s5997_s3 + $0x20] sm:$0xff] }
 0x113   : > { %v2495_v2 = vadd.f32 %v2494_v1, %v2476_v0  ;;  %3030 = vmatpush.bf16.msrb.mxu0 %v4799_v60  ;;  %v4782_v1 = vld [vmem:[%s5997_s3 + $0x60] sm:$0xff] }
 0x114   : > { %2809 = vmatpush.bf16.msra.mxu1 %v4782_v1 }
 0x117   : > { %v2513_v4 = vpop.f32.mrf.mxu2 }
 0x118   : > { %v2514_v5 = vadd.f32 %v2513_v4, %v2495_v2  ;;  %v2477_v7 = vpop.f32.mrf.mxu0  ;;  %v4790_v2 = vld [vmem:[%s5997_s3 + $0xa0] sm:$0xff] }
 0x119   : > { %v2532_v6 = vpop.f32.mrf.mxu3  ;;  %v2478_v8 = vadd.f32 %v2477_v7, %v2459_v48  ;;  %v4798_v4 = vld [vmem:[%s5997_s3 + $0xe0] sm:$0xff]  ;;  %2950 = vmatpush.bf16.msra.mxu3 %v4790_v2 }
 0x11a   : > { %v2533_v9 = vadd.f32 %v2532_v6, %v2514_v5  ;;  %v2496_v10 = vpop.f32.mrf.mxu1  ;;  %3031 = vmatpush.bf16.msrb.mxu0 %v4798_v4 }
 0x11b   : > { %v2497_v12 = vadd.f32 %v2496_v10, %v2478_v8 }
 0x11f   : > { %v2515_v13 = vpop.f32.mrf.mxu2 }
 0x120   : > { %v2516_v11 = vadd.f32 %v2515_v13, %v2497_v12  ;;  %v2480_v15 = vpop.f32.mrf.mxu0  ;;  %v4773_v13 = vld [vmem:[%s5997_s3 + $0x18] sm:$0xff] }
 0x121   : > { %v2534_v14 = vpop.f32.mrf.mxu3  ;;  %v5755_v16 = vadd.f32 %v2480_v15, %v2462_v57  ;;  %v4775_v57 = vld [vmem:[%s5997_s3 + $0x28] sm:$0xff] }
 0x122   : > { %v2535_v17 = vadd.f32 %v2534_v14, %v2516_v11  ;;  %v5757_v18 = vpop.f32.mrf.mxu1  ;;  %2869 = vmatpush.bf16.msra.mxu2 %v4775_v57  ;;  %v4781_v11 = vld [vmem:[%s5997_s3 + $0x58] sm:$0xff] }
 0x123   : > { %v2500_v5 = vadd.f32 %v5757_v18, %v5755_v16  ;;  %v4789_v14 = vld [vmem:[%s5997_s3 + $0x98] sm:$0xff]  ;;  %2810 = vmatpush.bf16.msra.mxu1 %v4781_v11 }
 0x124   : > { %v4797_v18 = vld [vmem:[%s5997_s3 + $0xd8] sm:$0xff]  ;;  %2951 = vmatpush.bf16.msra.mxu3 %v4789_v14 }
 0x125   : > { %3032 = vmatpush.bf16.msrb.mxu0 %v4797_v18 }
 0x126   : > { %2870 = vmatpush.bf16.msra.mxu2 %v4774_v61 }
 0x127   : > { %v5759_v19 = vpop.f32.mrf.mxu2 }
 0x128   : > { %v2482_v20 = vpop.f32.mrf.mxu0  ;;  %v2519_v8 = vadd.f32 %v5759_v19, %v2500_v5 }
 0x129   : > { %v5761_v21 = vadd.f32 %v2482_v20, %v2464_v63  ;;  %v5763_v22 = vpop.f32.mrf.mxu3 }
 0x12a   : > { %v5765_v23 = vpop.f32.mrf.mxu1  ;;  %2871 = vmatpush.bf16.msra.mxu2 %v4773_v13  ;;  %v2538_v20 = vadd.f32 %v5763_v22, %v2519_v8 }
 0x12f   : > { %v5767_v24 = vpop.f32.mrf.mxu2 }
 0x130   : > { %v2551_v25 = vpop.f32.mrf.mxu0 }
 0x131   : > { %v2552_v26 = vadd.f32 %v2551_v25, %v2533_v9  ;;  %v5769_v27 = vpop.f32.mrf.mxu3  ;;  %v2502_v9 = vadd.f32 %v5765_v23, %v5761_v21  ;;  %v4772_v23 = vld [vmem:[%s5997_s3 + $0x10] sm:$0xff] }
 0x132   : > { %v2570_v28 = vpop.f32.mrf.mxu1  ;;  %v4788_v25 = vld [vmem:[%s5997_s3 + $0x90] sm:$0xff]  ;;  %2872 = vmatpush.bf16.msra.mxu2 %v4772_v23 }
 0x133   : > { %v2571_v59 = vadd.f32 %v2570_v28, %v2552_v26  ;;  %v2521_v15 = vadd.f32 %v5767_v24, %v2502_v9  ;;  %v4780_v24 = vld [vmem:[%s5997_s3 + $0x50] sm:$0xff]  ;;  %2952 = vmatpush.bf16.msra.mxu3 %v4788_v25 }
 0x134   : > { %2811 = vmatpush.bf16.msra.mxu1 %v4780_v24 }
 0x135   : > { %v2540_v26 = vadd.f32 %v5769_v27, %v2521_v15  ;;  %v4771_v27 = vld [vmem:[%s5997_s3 + $0x8] sm:$0xff] }
 0x136   : > { %2873 = vmatpush.bf16.msra.mxu2 %v4771_v27  ;;  %v4814_v27 = vld [vmem:[%s6001_s7 + $0x20] sm:$0xff] }
 0x137   : > { %v2589_v31 = vpop.f32.mrf.mxu2 }
 0x138   : > { %v2553_v29 = vpop.f32.mrf.mxu0  ;;  %v2590_v62 = vadd.f32 %v2589_v31, %v2571_v59 }
 0x139   : > { %v2554_v30 = vadd.f32 %v2553_v29, %v2535_v17  ;;  %v2608_v35 = vpop.f32.mrf.mxu3  ;;  %v4796_v29 = vld [vmem:[%s5997_s3 + $0xd0] sm:$0xff] }
 0x13a   : > { %v2572_v37 = vpop.f32.mrf.mxu1  ;;  %v2609_v10 = vadd.f32 %v2608_v35, %v2590_v62  ;;  %3033 = vmatpush.bf16.msrb.mxu0 %v4796_v29  ;;  %2874 = vmatpush.bf16.msra.mxu2 %v4770_v45  ;;  %v4804_v29 = vld [vmem:[%s5999_s5 + $0x10] sm:$0xff] }
 0x13b   : > { %v2573_v63 = vadd.f32 %v2572_v37, %v2554_v30 }
 0x13f   : > { %v2591_v38 = vpop.f32.mrf.mxu2 }
 0x140   : > { %v5771_v36 = vpop.f32.mrf.mxu0  ;;  %v2592_v6 = vadd.f32 %v2591_v38, %v2573_v63 }
 0x141   : > { %v2610_v39 = vpop.f32.mrf.mxu3  ;;  %v2557_v28 = vadd.f32 %v5771_v36, %v2538_v20  ;;  %v4779_v36 = vld [vmem:[%s5997_s3 + $0x48] sm:$0xff] }
 0x142   : > { %v5775_v32 = vpop.f32.mrf.mxu1  ;;  %v2611_v16 = vadd.f32 %v2610_v39, %v2592_v6  ;;  %v4787_v39 = vld [vmem:[%s5997_s3 + $0x88] sm:$0xff]  ;;  %2812 = vmatpush.bf16.msra.mxu1 %v4779_v36 }
 0x143   : > { %2953 = vmatpush.bf16.msra.mxu3 %v4787_v39  ;;  %v4807_v6 = vld [vmem:[%s5999_s5 + $0x28] sm:$0xff] }
 0x146   : > { %2813 = vmatpush.bf16.msra.mxu1 %v4778_v46 }
 0x147   : > { %v5777_v40 = vpop.f32.mrf.mxu2 }
 0x148   : > { %v5773_v3 = vpop.f32.mrf.mxu0 }
 0x149   : > { %v5779_v42 = vpop.f32.mrf.mxu3  ;;  %v2559_v35 = vadd.f32 %v5773_v3, %v2540_v26  ;;  %v4795_v3 = vld [vmem:[%s5997_s3 + $0xc8] sm:$0xff] }
 0x14a   : > { %v5781_v43 = vpop.f32.mrf.mxu1  ;;  %3034 = vmatpush.bf16.msrb.mxu0 %v4795_v3  ;;  %v4813_v3 = vld [vmem:[%s6001_s7 + $0x18] sm:$0xff] }
 0x14b   : > { %v2578_v49 = vadd.f32 %v5781_v43, %v2559_v35  ;;  %v4817_v35 = vld [vmem:[%s6001_s7 + $0x38] sm:$0xff] }
 0x14c   : > { %3191 = vmatpush.bf16.msrb.mxu2 %v4817_v35 }
 0x14e   : > { %3035 = vmatpush.bf16.msrb.mxu0 %v4794_v51 }
 0x14f   : > { %v5783_v33 = vpop.f32.mrf.mxu2 }
 0x150   : > { %v2627_v41 = vpop.f32.mrf.mxu0 }
 0x151   : > { %v5797_v48 = vpop.f32.mrf.mxu3  ;;  %v2628_v17 = vadd.f32 %v2627_v41, %v2609_v10  ;;  %v2576_v41 = vadd.f32 %v5775_v32, %v2557_v28  ;;  %v4786_v32 = vld [vmem:[%s5997_s3 + $0x80] sm:$0xff] }
 0x152   : > { %v2646_v54 = vpop.f32.mrf.mxu1  ;;  %2954 = vmatpush.bf16.msra.mxu3 %v4786_v32  ;;  %v4806_v28 = vld [vmem:[%s5999_s5 + $0x20] sm:$0xff] }
 0x153   : > { %v2647_v22 = vadd.f32 %v2646_v54, %v2628_v17  ;;  %v2595_v47 = vadd.f32 %v5777_v40, %v2576_v41  ;;  %v2597_v54 = vadd.f32 %v5783_v33, %v2578_v49  ;;  %v4809_v33 = vld [vmem:[%s5999_s5 + $0x38] sm:$0xff]  ;;  %v4812_v41 = vld [vmem:[%s6001_s7 + $0x10] sm:$0xff] }
 0x154   : > { %3111 = vmatpush.bf16.msrb.mxu1 %v4809_v33  ;;  %v3142_v33 = vld [vmem:[%s6002_s8] sm:$0x1] }
 0x155   : > { %v2614_v40 = vadd.f32 %v5779_v42, %v2595_v47  ;;  %v2616_v59 = vadd.f32 %v5797_v48, %v2597_v54  ;;  %v4808_v42 = vld [vmem:[%s5999_s5 + $0x30] sm:$0xff] }
 0x157   : > { %v2665_v56 = vpop.f32.mrf.mxu2 }
 0x158   : > { %v2629_v34 = vpop.f32.mrf.mxu0  ;;  %v2666_v37 = vadd.f32 %v2665_v56, %v2647_v22  ;;  %3112 = vmatpush.bf16.msrb.mxu1 %v4808_v42  ;;  %v4805_v22 = vld [vmem:[%s5999_s5 + $0x18] sm:$0xff] }
 0x159   : > { %v2684_v0 = vpop.f32.mrf.mxu3  ;;  %v2630_v21 = vadd.f32 %v2629_v34, %v2611_v16 }
 0x15a   : > { %v2648_v12 = vpop.f32.mrf.mxu1  ;;  %v2685_v50 = vadd.f32 %v2684_v0, %v2666_v37  ;;  %v4816_v37 = vld [vmem:[%s6001_s7 + $0x30] sm:$0xff] }
 0x15b   : > { %v2649_v38 = vadd.f32 %v2648_v12, %v2630_v21  ;;  %3192 = vmatpush.bf16.msrb.mxu2 %v4816_v37 }
 0x15c   : > { %3113 = vmatpush.bf16.msrb.mxu1 %v4807_v6 }
 0x15f   : > { %v2667_v19 = vpop.f32.mrf.mxu2 }
 0x160   : > { %v5811_v55 = vpop.f32.mrf.mxu0  ;;  %v2668_v34 = vadd.f32 %v2667_v19, %v2649_v38  ;;  %3114 = vmatpush.bf16.msrb.mxu1 %v4806_v28  ;;  %v4815_v38 = vld [vmem:[%s6001_s7 + $0x28] sm:$0xff] }
 0x161   : > { %v2686_v30 = vpop.f32.mrf.mxu3  ;;  %v2633_v60 = vadd.f32 %v5811_v55, %v2614_v40  ;;  %3193 = vmatpush.bf16.msrb.mxu2 %v4815_v38  ;;  %v4810_v40 = vld [vmem:[%s6001_s7] sm:$0xff] }
 0x162   : > { %v2651_v44 = vpop.f32.mrf.mxu1  ;;  %v2687_v56 = vadd.f32 %v2686_v30, %v2668_v34  ;;  %v4803_v30 = vld [vmem:[%s5999_s5 + $0x8] sm:$0xff] }
 0x163   : > { %v2652_v2 = vadd.f32 %v2651_v44, %v2633_v60 }
 0x164   : > { %3115 = vmatpush.bf16.msrb.mxu1 %v4805_v22 }
 0x165   : > { %3194 = vmatpush.bf16.msrb.mxu2 %v4814_v27 }
 0x167   : > { %v2670_v53 = vpop.f32.mrf.mxu2 }
 0x168   : > { %v5839_v7 = vpop.f32.mrf.mxu0  ;;  %v2671_v5 = vadd.f32 %v2670_v53, %v2652_v2  ;;  %3116 = vmatpush.bf16.msrb.mxu1 %v4804_v29 }
 0x169   : > { %v2689_v58 = vpop.f32.mrf.mxu3  ;;  %v2635_v63 = vadd.f32 %v5839_v7, %v2616_v59  ;;  %3195 = vmatpush.bf16.msrb.mxu2 %v4813_v3 }
 0x16a   : > { %v2653_v1 = vpop.f32.mrf.mxu1  ;;  %v2690_v7 = vadd.f32 %v2689_v58, %v2671_v5 }
 0x16b   : > { %v2654_v55 = vadd.f32 %v2653_v1, %v2635_v63 }
 0x16c   : > { %3117 = vmatpush.bf16.msrb.mxu1 %v4803_v30 }
 0x16d   : > { %3196 = vmatpush.bf16.msrb.mxu2 %v4812_v41 }
 0x16f   : > { %v2672_v4 = vpop.f32.mrf.mxu2 }
 0x170   : > { %v2703_v31 = vpop.f32.mrf.mxu0  ;;  %v2673_v8 = vadd.f32 %v2672_v4, %v2654_v55 }
 0x171   : > { %v2704_v57 = vadd.f32 %v2703_v31, %v2685_v50  ;;  %v2691_v9 = vpop.f32.mrf.mxu3  ;;  %v4802_v31 = vld [vmem:[%s5999_s5] sm:$0xff] }
 0x172   : > { %v2692_v10 = vadd.f32 %v2691_v9, %v2673_v8  ;;  %3118 = vmatpush.bf16.msrb.mxu1 %v4802_v31  ;;  %v3042_v50 = vld [vmem:[%s5998_s4] sm:$0x1] }
 0x173   : > { %v2713_v61 = vmax.f32 %v2704_v57, 0.0 }
 0x178   : > { %v2705_v52 = vpop.f32.mrf.mxu0 }
 0x179   : > { %v2706_v43 = vadd.f32 %v2705_v52, %v2687_v56  ;;  %v4811_v52 = vld [vmem:[%s6001_s7 + $0x8] sm:$0xff] }
 0x17a   : > { %3197 = vmatpush.bf16.msrb.mxu2 %v4811_v52 }
 0x17b   : > { %v2714_v62 = vmax.f32 %v2706_v43, 0.0  ;;  %v3062_v43 = vld [vmem:[%s6000_s6] sm:$0x1] }
 0x17d   : > { %v2717_v0 = vmax.f32 %v2713_v61, %v2714_v62 }
 0x17e   : > { %3198 = vmatpush.bf16.msrb.mxu2 %v4810_v40 }
 0x180   : > { %v2708_v48 = vpop.f32.mrf.mxu0 }
 0x181   : > { %v2709_v12 = vadd.f32 %v2708_v48, %v2690_v7 }
 0x183   : > { %v2715_v14 = vmax.f32 %v2709_v12, 0.0 }
 0x188   : > { %v2710_v13 = vpop.f32.mrf.mxu0 }
 0x189   : > { %v2711_v11 = vadd.f32 %v2710_v13, %v2692_v10 }
 0x18b   : > { %v2716_v15 = vmax.f32 %v2711_v11, 0.0 }
 0x18d   : > { %v2718_v16 = vmax.f32 %v2715_v14, %v2716_v15 }
 0x18f   : > { %v2719_v17 = vmax.f32 %v2717_v0, %v2718_v16 }
 0x191   : > { %2720 = vst [vmem:[#allocation2] sm:$0xff] %v2719_v17 }
 0x198   : > { %v2739_v18 = vld [vmem:[#allocation2 + $0x1] sm:$0x1]  ;;  %v2721_v19 = vld [vmem:[#allocation2] sm:$0x1]  ;;  %v2880_v20 = vld [vmem:[#allocation2 + $0x2] sm:$0x1] }
 0x199   : > { %v2740_v21 = vpack.c.bf16 %v2739_v18, %v2739_v18  ;;  %v2722_v23 = vpack.c.bf16 %v2721_v19, %v2721_v19  ;;  %v2881_v24 = vpack.c.bf16 %v2880_v20, %v2880_v20  ;;  %v2961_v25 = vld [vmem:[#allocation2 + $0x3] sm:$0x1] }
 0x19a   : > { %v2962_v26 = vpack.c.bf16 %v2961_v25, %v2961_v25 }
 0x19b   : > { %2814 = vmatmul.bf16.vlgmr.msra.gmra.mxu1 %v2740_v21  ;;  %2875 = vmatmul.bf16.vlgmr.msra.gmra.mxu2 %v2722_v23 }
 0x19c   : > { %2955 = vmatmul.bf16.vlgmr.msra.gmra.mxu3 %v2881_v24  ;;  %3036 = vmatmul.bf16.vlgmr.msrb.gmra.mxu0 %v2962_v26 }
 0x218   : > { %v2815_v36 = vpop.f32.mrf.mxu1 }
 0x219   : > { %v3037_v39 = vpop.f32.mrf.mxu0 }
 0x21e   : > { %v2876_v34 = vpop.f32.mrf.mxu2 }
 0x21f   : > { %v2877_v44 = vadd.f32 %v2876_v34, %v2815_v36  ;;  %v2956_v45 = vpop.f32.mrf.mxu3 }
 0x220   : > { %v2817_v46 = vpop.f32.mrf.mxu1 }
 0x221   : > { %v2960_v47 = vadd.f32 %v2956_v45, %v2877_v44  ;;  %v3039_v49 = vpop.f32.mrf.mxu0 }
 0x223   : > { %v3041_v32 = vadd.f32 %v3037_v39, %v2960_v47 }
 0x225   : > { %v3043_v51 = vadd.f32 %v3042_v50, %v3041_v32 }
 0x226   : > { %v2878_v53 = vpop.f32.mrf.mxu2 }
 0x227   : > { %v3044_v54 = vmax.f32 %v3043_v51, 0.0  ;;  %v2958_v56 = vpop.f32.mrf.mxu3 }
 0x229   : > { %v3045_v57 = vpack.c.bf16 %v3044_v54, %v3044_v54 }
 0x22b   : > { %3119 = vmatmul.bf16.vlgmr.msrb.gmra.mxu1 %v3045_v57 }
 0x2a8   : > { %v3120_v58 = vpop.f32.mrf.mxu1 }
 0x2a9   : > { %v3121_v59 = vadd.f32 %v3120_v58, %v3062_v43 }
 0x2ab   : > { %v3124_v60 = vmax.f32 %v3121_v59, 0.0 }
 0x2ad   : > { %v3125_v61 = vpack.c.bf16 %v3124_v60, %v3124_v60 }
 0x2af   : > { %3199 = vmatmul.bf16.vlgmr.msrb.gmra.mxu2 %v3125_v61 }
 0x2b0   : > { %v3122_v62 = vpop.f32.mrf.mxu1 }
 0x332   : > { %v3200_v63 = vpop.f32.mrf.mxu2 }
 0x333   : > { %v3201_v0 = vadd.f32 %v3200_v63, %v3142_v33 }
 0x335   : > { %3204 = vst [vmem:[%s324_s26] sm:$0x1] %v3201_v0 }
 0x336   : > { %4886 = shalt.err (!%p4883_p3)
}
 0x337   : > { %4819 = dma.vmem_to_hbm [thread:$0]  (%p5011_p5), %s3217_s27, 16, %s3219_s29, %s3206_s21  }
 0x33a   : > { %v3202_v1 = vpop.f32.mrf.mxu2 }
 0x33b PF: > { %p4825_p4 = scmp.ge.s32.totalorder %s4921_s12, 2  ;;  %s3230_s17 = sand.u32 1, %s4909_s30  }
 0x33c   : > { %s3231_s24 = scalar_lea.sflag [#allocation4], %s3230_s17 }
 0x33d   : > { %p4822_p7 = pnand %p4825_p4, %p5015_p6 }
 0x33f   : > { %p4823_p8 = pneg %p4822_p7 }
 0x341   : > { %4904 = dma.done.wait (%p4823_p8), %s3231_s24, 16  }
 0x342   : > { %4906 = vsyncadd (%p4823_p8), %s3231_s24, 4294967280  ;;  %p19_p9 = scmp.ge.s32.totalorder %s4998_s15, 4   ;;  %s6006_s30 = smov %s4913_s10 }
 0x343   : > { %s6007_s10 = smov %s4917_s11  ;;  %s6008_s11 = smov %s5009_s18 }
 0x344   : > { %s6009_s12 = smov %s4998_s15  ;;  %21 = sbr.rel (!%p19_p9) target bundleno = 3 (0x3), region = 94 }
 0x349   :  { %3236 = vsyncpa [#allocation4], 1 }
 0x34a   :  { %3238 = vsyncpa [#allocation4 + $0x1], 1 }

</bundles_post_ra>
